<compile_context>
chip_gen: v5e
topology: v5e:2x2
jax: 0.10.0
libtpu: 0.0.40
codegen_flags: <defaults>
</compile_context>

<pallas_src>
import functools
import math

import jax
import jax.numpy as jnp
from jax.experimental import pallas as pl
from jax.experimental.pallas import tpu as pltpu

D_IN = 20
H1, H1_PAD = 200, 256
H2, H2_PAD = 400, 512
D_OUT = 784  # output lane dim kept at 784; Mosaic pads lanes internally


def _round_up(x, m):
    return (x + m - 1) // m * m


def decoder_kernel(x_ref, w1_ref, b1_ref, w2_ref, b2_ref, w3_ref, b3_ref, o_ref):
    # Layer 1: [tile, 20] @ [20, 256]   (bf16 MXU inputs, f32 accumulation)
    x = x_ref[...].astype(jnp.bfloat16)
    h1 = jnp.dot(x, w1_ref[...], preferred_element_type=jnp.float32)
    h1 = jnp.maximum(h1 + b1_ref[...], 0.0)

    # Layer 2: [tile, 256] @ [256, 512]
    h2 = jnp.dot(h1.astype(jnp.bfloat16), w2_ref[...],
                 preferred_element_type=jnp.float32)
    h2 = jnp.maximum(h2 + b2_ref[...], 0.0)

    # Layer 3: [tile, 512] @ [512, 784] + bias, sigmoid via EUP exp + recip.
    logits = jnp.dot(h2.astype(jnp.bfloat16), w3_ref[...],
                     preferred_element_type=jnp.float32)
    logits = logits + b3_ref[...]
    sig = pl.reciprocal(1.0 + jnp.exp(-logits), approx=True)
    # approx reciprocal can land slightly above 1; clamp (free on the VPU).
    o_ref[...] = jnp.clip(sig, 0.0, 1.0)


def prepare_params(params):
    """One-time host-side prep: zero-pad contraction dims, cast weights to bf16.

    Call this ONCE and reuse the result; it is intentionally outside the
    per-call jitted forward so no per-step pad/cast HBM traffic is incurred.
    Padded columns of w/b are zero, so ReLU of padded lanes is exactly 0 and
    the padded contraction rows of the next weight are zero => exact result.
    """
    w1 = jnp.zeros((D_IN, H1_PAD), jnp.float32).at[:, :H1].set(params["w1"])
    b1 = jnp.zeros((1, H1_PAD), jnp.float32).at[:, :H1].set(params["b1"])
    w2 = jnp.zeros((H1_PAD, H2_PAD), jnp.float32).at[:H1, :H2].set(params["w2"])
    b2 = jnp.zeros((1, H2_PAD), jnp.float32).at[:, :H2].set(params["b2"])
    w3 = jnp.zeros((H2_PAD, D_OUT), jnp.float32).at[:H2, :].set(params["w3"])
    b3 = jnp.asarray(params["b3"], jnp.float32).reshape(1, D_OUT)
    return (w1.astype(jnp.bfloat16), b1,
            w2.astype(jnp.bfloat16), b2,
            w3.astype(jnp.bfloat16), b3)


def _choose_tiling(B, batch_tile):
    """Pick (b_pad, tile).

    Small batches (B <= 128): pad rows only to the 8-sublane multiple and run
    a single grid step (no wasted MXU work or HBM writeback).
    Large batches: 128-multiple tiles, capped at b_pad//2 when possible so the
    grid has >= 2 steps (lets the "parallel" axis use both v7x TensorCores).
    """
    if B <= 128:
        tile = max(8, _round_up(B, 8))
        return tile, tile
    tile = max(128, _round_up(batch_tile, 128))
    b_pad = _round_up(B, 128)
    tile = min(tile, b_pad)
    if b_pad >= 256:
        tile = min(tile, max(128, (b_pad // 2) // 128 * 128))
    b_pad = _round_up(B, tile)
    return b_pad, tile


@functools.partial(jax.jit, static_argnames=("batch_tile",))
def decoder_forward(x, w1, b1, w2, b2, w3, b3, *, batch_tile=1024):
    """x: [B, 20] float32. w*/b*: outputs of prepare_params (padded, bf16 w)."""
    B = x.shape[0]
    assert x.shape[1] == D_IN

    b_pad, tile = _choose_tiling(B, batch_tile)

    x_pad = x
    if b_pad != B:
        x_pad = jnp.zeros((b_pad, D_IN), x.dtype).at[:B].set(x)

    grid = (b_pad // tile,)

    def weight_spec(shape):
        # Small grid-invariant weights/biases: resident in VMEM every step.
        return pl.BlockSpec(shape, lambda i: (0, 0))

    out = pl.pallas_call(
        decoder_kernel,
        out_shape=jax.ShapeDtypeStruct((b_pad, D_OUT), jnp.float32),
        grid=grid,
        in_specs=[
            pl.BlockSpec((tile, D_IN), lambda i: (i, 0)),   # x row tile
            weight_spec(w1.shape),
            weight_spec(b1.shape),
            weight_spec(w2.shape),
            weight_spec(b2.shape),
            weight_spec(w3.shape),
            weight_spec(b3.shape),
        ],
        out_specs=pl.BlockSpec((tile, D_OUT), lambda i: (i, 0)),
        compiler_params=pltpu.CompilerParams(
            dimension_semantics=("parallel",),
            vmem_limit_bytes=40 * 1024 * 1024,
        ),
    )(x_pad, w1, b1, w2, b2, w3, b3)

    # Columns are already exact (784); slice rows only if they were padded.
    if b_pad != B:
        out = out[:B]
    return out


def init_params(key):
    """Deterministic init mirroring nn.Linear's uniform(-1/sqrt(fan_in), +)."""
    dims = [(20, 200), (200, 400), (400, 784)]
    params = {}
    for idx, (fan_in, fan_out) in enumerate(dims, start=1):
        key, kw, kb = jax.random.split(key, 3)
        bound = 1.0 / math.sqrt(fan_in)
        params[f"w{idx}"] = jax.random.uniform(
            kw, (fan_in, fan_out), jnp.float32, -bound, bound
        )
        params[f"b{idx}"] = jax.random.uniform(
            kb, (1, fan_out), jnp.float32, -bound, bound
        )
    return params


def reference_forward(x, params):
    h1 = jnp.maximum(x @ params["w1"] + params["b1"], 0.0)
    h2 = jnp.maximum(h1 @ params["w2"] + params["b2"], 0.0)
    return jax.nn.sigmoid(h2 @ params["w3"] + params["b3"])


if __name__ == "__main__":
    key = jax.random.PRNGKey(0)
    key, kx = jax.random.split(key)

    B = 8  # small test batch; rows only padded to the 8-sublane multiple (here: none)
    x = jax.random.normal(kx, (B, D_IN), dtype=jnp.float32)
    params = init_params(key)

    # One-time weight prep (outside the per-call path).
    padded_params = prepare_params(params)

    out = decoder_forward(x, *padded_params)
    out = jax.block_until_ready(out)

    ref = reference_forward(x, params)
    assert out.shape == (B, D_OUT)
    # bf16 MXU inputs + approx EUP reciprocal => loosened tolerance vs f32 reference.
    assert jnp.allclose(out, ref, atol=2e-2, rtol=0.0), "mismatch vs JAX reference"

    print("KERNEL_OK")
</pallas_src>

<mosaic_0001>
module attributes {stable_mosaic.version = 11 : i64} {
  func.func @decoder_kernel(%arg0: i32, %arg1: memref<8x20xf32, #tpu.memory_space<vmem>>, %arg2: memref<20x256xbf16, #tpu.memory_space<vmem>>, %arg3: memref<1x256xf32, #tpu.memory_space<vmem>>, %arg4: memref<256x512xbf16, #tpu.memory_space<vmem>>, %arg5: memref<1x512xf32, #tpu.memory_space<vmem>>, %arg6: memref<512x784xbf16, #tpu.memory_space<vmem>>, %arg7: memref<1x784xf32, #tpu.memory_space<vmem>>, %arg8: memref<8x784xf32, #tpu.memory_space<vmem>>) attributes {dimension_semantics = [#tpu.dimension_semantics<parallel>], iteration_bounds = array<i64: 1>, scalar_prefetch = 0 : i64, scratch_operands = 0 : i64, tpu.core_type = #tpu.core_type<tc>, window_params = [{transform_indices = @transform_0, window_bounds = array<i64: 8, 20>}, {pipeline_mode = #tpu.pipeline_mode<synchronous>, transform_indices = @transform_1, window_bounds = array<i64: 20, 256>}, {pipeline_mode = #tpu.pipeline_mode<synchronous>, transform_indices = @transform_2, window_bounds = array<i64: 1, 256>}, {pipeline_mode = #tpu.pipeline_mode<synchronous>, transform_indices = @transform_3, window_bounds = array<i64: 256, 512>}, {pipeline_mode = #tpu.pipeline_mode<synchronous>, transform_indices = @transform_4, window_bounds = array<i64: 1, 512>}, {pipeline_mode = #tpu.pipeline_mode<synchronous>, transform_indices = @transform_5, window_bounds = array<i64: 512, 784>}, {pipeline_mode = #tpu.pipeline_mode<synchronous>, transform_indices = @transform_6, window_bounds = array<i64: 1, 784>}, {transform_indices = @transform_7, window_bounds = array<i64: 8, 784>}]} {
    %c0 = arith.constant 0 : index
    %c0_0 = arith.constant 0 : index
    %0 = vector.load %arg1[%c0, %c0_0] : memref<8x20xf32, #tpu.memory_space<vmem>>, vector<8x20xf32>
    %1 = arith.truncf %0 : vector<8x20xf32> to vector<8x20xbf16>
    %c0_1 = arith.constant 0 : index
    %c0_2 = arith.constant 0 : index
    %2 = vector.load %arg2[%c0_1, %c0_2] : memref<20x256xbf16, #tpu.memory_space<vmem>>, vector<20x256xbf16>
    %cst = arith.constant dense<0.000000e+00> : vector<8x256xf32>
    %3 = tpu.matmul %1, %2, %cst {dimension_numbers = #tpu.dot_dimension_numbers<[1], [0], [0], [1], [0, 0, 1, 1], [], []>} : vector<8x20xbf16>, vector<20x256xbf16>, vector<8x256xf32> -> vector<8x256xf32>
    %c0_3 = arith.constant 0 : index
    %c0_4 = arith.constant 0 : index
    %4 = vector.load %arg3[%c0_3, %c0_4] : memref<1x256xf32, #tpu.memory_space<vmem>>, vector<1x256xf32>
    %5 = vector.broadcast %4 : vector<1x256xf32> to vector<8x256xf32>
    %6 = arith.addf %3, %5 : vector<8x256xf32>
    %cst_5 = arith.constant 0.000000e+00 : f32
    %7 = vector.broadcast %cst_5 : f32 to vector<8x256xf32>
    %8 = arith.maximumf %6, %7 : vector<8x256xf32>
    %9 = arith.truncf %8 : vector<8x256xf32> to vector<8x256xbf16>
    %c0_6 = arith.constant 0 : index
    %c0_7 = arith.constant 0 : index
    %10 = vector.load %arg4[%c0_6, %c0_7] : memref<256x512xbf16, #tpu.memory_space<vmem>>, vector<256x512xbf16>
    %cst_8 = arith.constant dense<0.000000e+00> : vector<8x512xf32>
    %11 = tpu.matmul %9, %10, %cst_8 {dimension_numbers = #tpu.dot_dimension_numbers<[1], [0], [0], [1], [0, 0, 1, 1], [], []>} : vector<8x256xbf16>, vector<256x512xbf16>, vector<8x512xf32> -> vector<8x512xf32>
    %c0_9 = arith.constant 0 : index
    %c0_10 = arith.constant 0 : index
    %12 = vector.load %arg5[%c0_9, %c0_10] : memref<1x512xf32, #tpu.memory_space<vmem>>, vector<1x512xf32>
    %13 = vector.broadcast %12 : vector<1x512xf32> to vector<8x512xf32>
    %14 = arith.addf %11, %13 : vector<8x512xf32>
    %cst_11 = arith.constant 0.000000e+00 : f32
    %15 = vector.broadcast %cst_11 : f32 to vector<8x512xf32>
    %16 = arith.maximumf %14, %15 : vector<8x512xf32>
    %17 = arith.truncf %16 : vector<8x512xf32> to vector<8x512xbf16>
    %c0_12 = arith.constant 0 : index
    %c0_13 = arith.constant 0 : index
    %18 = vector.load %arg6[%c0_12, %c0_13] : memref<512x784xbf16, #tpu.memory_space<vmem>>, vector<512x784xbf16>
    %cst_14 = arith.constant dense<0.000000e+00> : vector<8x784xf32>
    %19 = tpu.matmul %17, %18, %cst_14 {dimension_numbers = #tpu.dot_dimension_numbers<[1], [0], [0], [1], [0, 0, 1, 1], [], []>} : vector<8x512xbf16>, vector<512x784xbf16>, vector<8x784xf32> -> vector<8x784xf32>
    %c0_15 = arith.constant 0 : index
    %c0_16 = arith.constant 0 : index
    %20 = vector.load %arg7[%c0_15, %c0_16] : memref<1x784xf32, #tpu.memory_space<vmem>>, vector<1x784xf32>
    %21 = vector.broadcast %20 : vector<1x784xf32> to vector<8x784xf32>
    %22 = arith.addf %19, %21 : vector<8x784xf32>
    %cst_17 = arith.constant 0.000000e+00 : f32
    %23 = vector.broadcast %cst_17 : f32 to vector<8x784xf32>
    %24 = arith.subf %23, %22 : vector<8x784xf32>
    %25 = math.exp %24 : vector<8x784xf32>
    %cst_18 = arith.constant 1.000000e+00 : f32
    %26 = vector.broadcast %cst_18 : f32 to vector<8x784xf32>
    %27 = arith.addf %26, %25 : vector<8x784xf32>
    %28 = tpu.reciprocal %27 {approx = true} : vector<8x784xf32> -> vector<8x784xf32>
    %cst_19 = arith.constant 0.000000e+00 : f32
    %cst_20 = arith.constant 1.000000e+00 : f32
    %29 = vector.broadcast %cst_19 : f32 to vector<8x784xf32>
    %30 = arith.maximumf %29, %28 : vector<8x784xf32>
    %31 = vector.broadcast %cst_20 : f32 to vector<8x784xf32>
    %32 = arith.minimumf %31, %30 : vector<8x784xf32>
    %c0_21 = arith.constant 0 : index
    %c0_22 = arith.constant 0 : index
    %33 = vector.load %arg8[%c0_21, %c0_22] : memref<8x784xf32, #tpu.memory_space<vmem>>, vector<8x784xf32>
    tpu.vector_store %arg8[%c0_21, %c0_22], %32 {strides = array<i32>} : memref<8x784xf32, #tpu.memory_space<vmem>>, vector<8x784xf32>,
    return
  }
  func.func @transform_0(%arg0: i32) -> (i32, i32) {
    %c0_i32 = arith.constant 0 : i32
    %c0_i32_0 = arith.constant 0 : i32
    return %arg0, %c0_i32 : i32, i32
  }
  func.func @transform_1(%arg0: i32) -> (i32, i32) {
    %c0_i32 = arith.constant 0 : i32
    %c0_i32_0 = arith.constant 0 : i32
    %c0_i32_1 = arith.constant 0 : i32
    return %c0_i32, %c0_i32_0 : i32, i32
  }
  func.func @transform_2(%arg0: i32) -> (i32, i32) {
    %c0_i32 = arith.constant 0 : i32
    %c0_i32_0 = arith.constant 0 : i32
    %c0_i32_1 = arith.constant 0 : i32
    return %c0_i32, %c0_i32_0 : i32, i32
  }
  func.func @transform_3(%arg0: i32) -> (i32, i32) {
    %c0_i32 = arith.constant 0 : i32
    %c0_i32_0 = arith.constant 0 : i32
    %c0_i32_1 = arith.constant 0 : i32
    return %c0_i32, %c0_i32_0 : i32, i32
  }
  func.func @transform_4(%arg0: i32) -> (i32, i32) {
    %c0_i32 = arith.constant 0 : i32
    %c0_i32_0 = arith.constant 0 : i32
    %c0_i32_1 = arith.constant 0 : i32
    return %c0_i32, %c0_i32_0 : i32, i32
  }
  func.func @transform_5(%arg0: i32) -> (i32, i32) {
    %c0_i32 = arith.constant 0 : i32
    %c0_i32_0 = arith.constant 0 : i32
    %c0_i32_1 = arith.constant 0 : i32
    return %c0_i32, %c0_i32_0 : i32, i32
  }
  func.func @transform_6(%arg0: i32) -> (i32, i32) {
    %c0_i32 = arith.constant 0 : i32
    %c0_i32_0 = arith.constant 0 : i32
    %c0_i32_1 = arith.constant 0 : i32
    return %c0_i32, %c0_i32_0 : i32, i32
  }
  func.func @transform_7(%arg0: i32) -> (i32, i32) {
    %c0_i32 = arith.constant 0 : i32
    %c0_i32_0 = arith.constant 0 : i32
    return %arg0, %c0_i32 : i32, i32
  }
}

</mosaic_0001>

<bundles_post_ra>
// kernel: decoder_forward.1
= control target key start
LH: loop header
LB: loop body
LE: loop exit
PB: predicated region body
PF: predicated region fallthrough
CT: control target
= control target key end

     0   :  { %vm58_vm0 = vcmask 1041408   ;;  %vm54_vm1 = vcmask 162816   ;;  %s5836_s0 = inlined_call_operand.vmem [shape: f32[8,20], index: 0, kind: input, shape index: {}]   ;;  %s5837_s1 = inlined_call_operand.vmem [shape: bf16[20,256], index: 1, kind: input, shape index: {}]   ;;  %s5838_s2 = inlined_call_operand.vmem [shape: f32[1,256], index: 2, kind: input, shape index: {}]   ;;  %s5839_s3 = inlined_call_operand.vmem [shape: bf16[256,512], index: 3, kind: input, shape index: {}]   ;;  %s5840_s4 = inlined_call_operand.vmem [shape: f32[1,512], index: 4, kind: input, shape index: {}]   ;;  %s5841_s5 = inlined_call_operand.vmem [shape: bf16[512,784], index: 5, kind: input, shape index: {}]   ;;  %s5842_s6 = inlined_call_operand.vmem [shape: f32[1,784], index: 6, kind: input, shape index: {}]   ;;  %s5843_s7 = inlined_call_operand.hbm [shape: f32[8,784], index: 7, kind: output, shape index: {}]  }
   0x1   :  { %v32_v0 = vld [vmem:[%s5837_s1 + $0x10] sm:$0x33]  ;;  %v2464_v3 = vld [vmem:[%s5837_s1] sm:$0xf]  ;;  %v3625_v4 = vld [vmem:[%s5837_s1 + $0x4] sm:$0xf0] }
   0x2   :  { %v46_v1 = vunpack.c.l.b16 %v32_v0  ;;  %v47_v2 = vunpack.c.h.b16 %v32_v0  ;;  %v3624_v5 = vld [vmem:[%s5837_s1 + $0x4] sm:$0xf]  ;;  %v2466_v6 = vld [vmem:[%s5837_s1 + $0x8] sm:$0xf0]  ;;  %v2586_v7 = vld [vmem:[%s5839_s3 + $0xe0] sm:$0xf]  ;;  %v2465_v23 = vor.u32 %v3625_v4, %v2464_v3 }
   0x3   :  { %v3656_v8 = vld [vmem:[%s5839_s3 + $0xec] sm:$0xf0]  ;;  %v2714_v12 = vld [vmem:[%s5839_s3 + $0x1e0] sm:$0xf]  ;;  %v3654_v14 = vld [vmem:[%s5839_s3 + $0xe4] sm:$0xf]  ;;  %v2469_v24 = vor.u32 %v3624_v5, %v2466_v6 }
   0x4   :  { %v50_v9 = vpack.c.b16 %v46_v1, %v46_v1  ;;  %v51_v10 = vpack.c.b16 %v47_v2, %v47_v2  ;;  %v2587_v11 = vor.u32 %v3656_v8, %v2586_v7  ;;  %v3688_v13 = vld [vmem:[%s5839_s3 + $0x1ec] sm:$0xf0]  ;;  %v2588_v16 = vld [vmem:[%s5839_s3 + $0xf0] sm:$0xf0]  ;;  %v3686_v17 = vld [vmem:[%s5839_s3 + $0x1e4] sm:$0xf] }
   0x5   :  { %v2715_v15 = vor.u32 %v3688_v13, %v2714_v12  ;;  %v2716_v18 = vld [vmem:[%s5839_s3 + $0x1f0] sm:$0xf0]  ;;  %v2570_v21 = vld [vmem:[%s5839_s3 + $0xc0] sm:$0xf]  ;;  %v3652_v22 = vld [vmem:[%s5839_s3 + $0xcc] sm:$0xf0]  ;;  %v2591_v29 = vor.u32 %v3654_v14, %v2588_v16 }
   0x6   :  { %v60_v19 = vsel %vm58_vm0, %v50_v9, 0  ;;  %v63_v20 = vsel %vm58_vm0, %v51_v10, 0  ;;  %489 = vmatpush.bf16.msra.mxu2 %v2587_v11  ;;  %v28_v25 = vld [vmem:[%s5836_s0] sm:$0xff]  ;;  %v2571_v26 = vor.u32 %v3652_v22, %v2570_v21  ;;  %v3684_v28 = vld [vmem:[%s5839_s3 + $0x1cc] sm:$0xf0]  ;;  %v2719_v30 = vor.u32 %v3686_v17, %v2716_v18 }
   0x7   :  { %71 = vmatpush.bf16.msra.mxu0 %v60_v19  ;;  %84 = vmatpush.bf16.msra.mxu1 %v63_v20  ;;  %v2698_v27 = vld [vmem:[%s5839_s3 + $0x1c0] sm:$0xf]  ;;  %v3650_v31 = vld [vmem:[%s5839_s3 + $0xc4] sm:$0xf]  ;;  %v2572_v32 = vld [vmem:[%s5839_s3 + $0xd0] sm:$0xf0]  ;;  %v29_v38 = vpack.c.bf16 %v28_v25, %v28_v25 }
   0x8   :  { %502 = vmatpush.bf16.msra.mxu3 %v2715_v15  ;;  %v3682_v33 = vld [vmem:[%s5839_s3 + $0x1c4] sm:$0xf]  ;;  %v2699_v34 = vor.u32 %v3684_v28, %v2698_v27  ;;  %v2700_v35 = vld [vmem:[%s5839_s3 + $0x1d0] sm:$0xf0]  ;;  %v2554_v36 = vld [vmem:[%s5839_s3 + $0xa0] sm:$0xf]  ;;  %v2575_v42 = vor.u32 %v3650_v31, %v2572_v32 }
   0x9   :  { %v3648_v37 = vld [vmem:[%s5839_s3 + $0xac] sm:$0xf0]  ;;  %v2682_v39 = vld [vmem:[%s5839_s3 + $0x1a0] sm:$0xf]  ;;  %v2703_v43 = vor.u32 %v3682_v33, %v2700_v35  ;;  %v3646_v44 = vld [vmem:[%s5839_s3 + $0xa4] sm:$0xf] }
   0xa   :  { %490 = vmatpush.bf16.msra.mxu2 %v2571_v26  ;;  %v3680_v40 = vld [vmem:[%s5839_s3 + $0x1ac] sm:$0xf0]  ;;  %v2555_v41 = vor.u32 %v3648_v37, %v2554_v36  ;;  %v2538_v45 = vld [vmem:[%s5839_s3 + $0x80] sm:$0xf]  ;;  %v2556_v48 = vld [vmem:[%s5839_s3 + $0xb0] sm:$0xf0] }
   0xb   :  { %72 = vmatpush.bf16.msra.mxu0 %v2465_v23  ;;  %85 = vmatpush.bf16.msra.mxu1 %v2469_v24  ;;  %v3644_v46 = vld [vmem:[%s5839_s3 + $0x8c] sm:$0xf0]  ;;  %v2683_v47 = vor.u32 %v3680_v40, %v2682_v39  ;;  %v3678_v49 = vld [vmem:[%s5839_s3 + $0x1a4] sm:$0xf]  ;;  %v2684_v50 = vld [vmem:[%s5839_s3 + $0x1b0] sm:$0xf0]  ;;  %v2559_v54 = vor.u32 %v3646_v44, %v2556_v48 }
   0xc   :  { %503 = vmatpush.bf16.msra.mxu3 %v2699_v34  ;;  %v2666_v51 = vld [vmem:[%s5839_s3 + $0x180] sm:$0xf]  ;;  %v3676_v52 = vld [vmem:[%s5839_s3 + $0x18c] sm:$0xf0]  ;;  %v2539_v53 = vor.u32 %v3644_v46, %v2538_v45  ;;  %v2687_v55 = vor.u32 %v3678_v49, %v2684_v50  ;;  %v3642_v56 = vld [vmem:[%s5839_s3 + $0x84] sm:$0xf] }
   0xd   :  { %v2522_v57 = vld [vmem:[%s5839_s3 + $0x60] sm:$0xf]  ;;  %v3640_v58 = vld [vmem:[%s5839_s3 + $0x6c] sm:$0xf0]  ;;  %v2667_v59 = vor.u32 %v3676_v52, %v2666_v51  ;;  %v2540_v60 = vld [vmem:[%s5839_s3 + $0x90] sm:$0xf0] }
   0xe   :  { %2470 = vmatmul.msk.bf16.vlgmr.msra.gmra.mxu0 %vm54_vm1, %v29_v38  ;;  %2471 = vmatmul.msk.bf16.vlgmr.msra.gmra.mxu1 %vm54_vm1, %v29_v38  ;;  %v3674_v61 = vld [vmem:[%s5839_s3 + $0x184] sm:$0xf]  ;;  %v2668_v62 = vld [vmem:[%s5839_s3 + $0x190] sm:$0xf0]  ;;  %v2650_v63 = vld [vmem:[%s5839_s3 + $0x160] sm:$0xf]  ;;  %v2523_v1 = vor.u32 %v3640_v58, %v2522_v57  ;;  %v2543_v2 = vor.u32 %v3642_v56, %v2540_v60 }
   0xf   :  { %515 = vmatpush.bf16.msrb.mxu0 %v2591_v29  ;;  %528 = vmatpush.bf16.msrb.mxu1 %v2719_v30  ;;  %v3672_v0 = vld [vmem:[%s5839_s3 + $0x16c] sm:$0xf0]  ;;  %v2671_v3 = vor.u32 %v3674_v61, %v2668_v62  ;;  %v3638_v4 = vld [vmem:[%s5839_s3 + $0x64] sm:$0xf]  ;;  %v2506_v5 = vld [vmem:[%s5839_s3 + $0x40] sm:$0xf] }
  0x10   :  { %491 = vmatpush.bf16.msra.mxu2 %v2555_v41  ;;  %504 = vmatpush.bf16.msra.mxu3 %v2683_v47  ;;  %v3636_v6 = vld [vmem:[%s5839_s3 + $0x4c] sm:$0xf0]  ;;  %v2651_v7 = vor.u32 %v3672_v0, %v2650_v63  ;;  %v2524_v8 = vld [vmem:[%s5839_s3 + $0x70] sm:$0xf0]  ;;  %v3670_v9 = vld [vmem:[%s5839_s3 + $0x164] sm:$0xf] }
  0x11   :  { %v2652_v10 = vld [vmem:[%s5839_s3 + $0x170] sm:$0xf0]  ;;  %v2634_v11 = vld [vmem:[%s5839_s3 + $0x140] sm:$0xf]  ;;  %v3668_v12 = vld [vmem:[%s5839_s3 + $0x14c] sm:$0xf0]  ;;  %v2507_v13 = vor.u32 %v3636_v6, %v2506_v5  ;;  %v2527_v14 = vor.u32 %v3638_v4, %v2524_v8 }
  0x12   :  { %v2655_v15 = vor.u32 %v3670_v9, %v2652_v10  ;;  %v3634_v16 = vld [vmem:[%s5839_s3 + $0x44] sm:$0xf]  ;;  %v2490_v17 = vld [vmem:[%s5839_s3 + $0x20] sm:$0xf]  ;;  %v3632_v18 = vld [vmem:[%s5839_s3 + $0x2c] sm:$0xf0]  ;;  %v2635_v19 = vor.u32 %v3668_v12, %v2634_v11 }
  0x13   :  { %516 = vmatpush.bf16.msrb.mxu0 %v2575_v42  ;;  %529 = vmatpush.bf16.msrb.mxu1 %v2703_v43  ;;  %v2508_v20 = vld [vmem:[%s5839_s3 + $0x50] sm:$0xf0]  ;;  %v3666_v21 = vld [vmem:[%s5839_s3 + $0x144] sm:$0xf]  ;;  %v2618_v23 = vld [vmem:[%s5839_s3 + $0x120] sm:$0xf]  ;;  %v2491_v25 = vor.u32 %v3632_v18, %v2490_v17 }
  0x14   :  { %492 = vmatpush.bf16.msra.mxu2 %v2539_v53  ;;  %505 = vmatpush.bf16.msra.mxu3 %v2667_v59  ;;  %v2636_v22 = vld [vmem:[%s5839_s3 + $0x150] sm:$0xf0]  ;;  %v3664_v24 = vld [vmem:[%s5839_s3 + $0x12c] sm:$0xf0]  ;;  %v3630_v26 = vld [vmem:[%s5839_s3 + $0x24] sm:$0xf]  ;;  %v2511_v28 = vor.u32 %v3634_v16, %v2508_v20 }
  0x15   :  { %v2492_v27 = vld [vmem:[%s5839_s3 + $0x30] sm:$0xf0]  ;;  %v2639_v29 = vor.u32 %v3666_v21, %v2636_v22  ;;  %v3662_v30 = vld [vmem:[%s5839_s3 + $0x124] sm:$0xf]  ;;  %v2474_v31 = vld [vmem:[%s5839_s3] sm:$0xf]  ;;  %v2619_v33 = vor.u32 %v3664_v24, %v2618_v23 }
  0x16   :  { %v3628_v32 = vld [vmem:[%s5839_s3 + $0xc] sm:$0xf0]  ;;  %v2620_v34 = vld [vmem:[%s5839_s3 + $0x130] sm:$0xf0]  ;;  %v2602_v35 = vld [vmem:[%s5839_s3 + $0x100] sm:$0xf] }
  0x17   :  { %517 = vmatpush.bf16.msrb.mxu0 %v2559_v54  ;;  %530 = vmatpush.bf16.msrb.mxu1 %v2687_v55  ;;  %v3660_v36 = vld [vmem:[%s5839_s3 + $0x10c] sm:$0xf0]  ;;  %v2594_v37 = vld [vmem:[%s5839_s3 + $0xe8] sm:$0xf]  ;;  %v3657_v38 = vld [vmem:[%s5839_s3 + $0xf4] sm:$0xf0] }
  0x18   :  { %493 = vmatpush.bf16.msra.mxu2 %v2523_v1  ;;  %506 = vmatpush.bf16.msra.mxu3 %v2651_v7 }
  0x1b   :  { %518 = vmatpush.bf16.msrb.mxu0 %v2543_v2  ;;  %531 = vmatpush.bf16.msrb.mxu1 %v2671_v3 }
  0x1c   :  { %494 = vmatpush.bf16.msra.mxu2 %v2507_v13  ;;  %507 = vmatpush.bf16.msra.mxu3 %v2635_v19 }
  0x1f   :  { %519 = vmatpush.bf16.msrb.mxu0 %v2527_v14  ;;  %532 = vmatpush.bf16.msrb.mxu1 %v2655_v15 }
  0x20   :  { %12 = vsyncpa [#allocation3], 0  ;;  %495 = vmatpush.bf16.msra.mxu2 %v2491_v25  ;;  %v2475_v39 = vor.u32 %v3628_v32, %v2474_v31  ;;  %v2722_v40 = vld [vmem:[%s5839_s3 + $0x1e8] sm:$0xf]  ;;  %v3689_v41 = vld [vmem:[%s5839_s3 + $0x1f4] sm:$0xf0]  ;;  %v2495_v42 = vor.u32 %v3630_v26, %v2492_v27  ;;  %v2623_v43 = vor.u32 %v3662_v30, %v2620_v34  ;;  %508 = vmatpush.bf16.msra.mxu3 %v2619_v33 }
  0x21   :  { %v3626_v44 = vld [vmem:[%s5839_s3 + $0x4] sm:$0xf]  ;;  %v2476_v45 = vld [vmem:[%s5839_s3 + $0x10] sm:$0xf0]  ;;  %v2603_v47 = vor.u32 %v3660_v36, %v2602_v35  ;;  %v2595_v49 = vor.u32 %v3657_v38, %v2594_v37  ;;  %v3655_v50 = vld [vmem:[%s5839_s3 + $0xec] sm:$0xf]  ;;  %v2723_v52 = vor.u32 %v3689_v41, %v2722_v40 }
  0x22   :  { %v3658_v46 = vld [vmem:[%s5839_s3 + $0x104] sm:$0xf]  ;;  %v2604_v48 = vld [vmem:[%s5839_s3 + $0x110] sm:$0xf0]  ;;  %v2596_v51 = vld [vmem:[%s5839_s3 + $0xf8] sm:$0xf0]  ;;  %v2479_v59 = vor.u32 %v3626_v44, %v2476_v45 }
  0x23   :  { %520 = vmatpush.bf16.msrb.mxu0 %v2511_v28  ;;  %533 = vmatpush.bf16.msrb.mxu1 %v2639_v29  ;;  %v3687_v53 = vld [vmem:[%s5839_s3 + $0x1ec] sm:$0xf]  ;;  %v2724_v54 = vld [vmem:[%s5839_s3 + $0x1f8] sm:$0xf0]  ;;  %v2578_v55 = vld [vmem:[%s5839_s3 + $0xc8] sm:$0xf]  ;;  %v2607_v60 = vor.u32 %v3658_v46, %v2604_v48  ;;  %v2599_v61 = vor.u32 %v3655_v50, %v2596_v51 }
  0x24   :  { %496 = vmatpush.bf16.msra.mxu2 %v2475_v39  ;;  %v3653_v56 = vld [vmem:[%s5839_s3 + $0xd4] sm:$0xf0]  ;;  %v2706_v57 = vld [vmem:[%s5839_s3 + $0x1c8] sm:$0xf]  ;;  %509 = vmatpush.bf16.msra.mxu3 %v2603_v47  ;;  %v2727_v62 = vor.u32 %v3687_v53, %v2724_v54  ;;  %v3651_v63 = vld [vmem:[%s5839_s3 + $0xcc] sm:$0xf] }
  0x25   :  { %v3685_v58 = vld [vmem:[%s5839_s3 + $0x1d4] sm:$0xf0]  ;;  %v2579_v0 = vor.u32 %v3653_v56, %v2578_v55  ;;  %v2580_v2 = vld [vmem:[%s5839_s3 + $0xd8] sm:$0xf0]  ;;  %v3683_v3 = vld [vmem:[%s5839_s3 + $0x1cc] sm:$0xf] }
  0x26   :  { %v2707_v1 = vor.u32 %v3685_v58, %v2706_v57  ;;  %v2708_v4 = vld [vmem:[%s5839_s3 + $0x1d8] sm:$0xf0]  ;;  %v2583_v5 = vor.u32 %v3651_v63, %v2580_v2  ;;  %v2562_v7 = vld [vmem:[%s5839_s3 + $0xa8] sm:$0xf]  ;;  %v3649_v8 = vld [vmem:[%s5839_s3 + $0xb4] sm:$0xf0] }
  0x27   :  { %521 = vmatpush.bf16.msrb.mxu0 %v2495_v42  ;;  %534 = vmatpush.bf16.msrb.mxu1 %v2623_v43  ;;  %v2711_v6 = vor.u32 %v3683_v3, %v2708_v4  ;;  %v2690_v9 = vld [vmem:[%s5839_s3 + $0x1a8] sm:$0xf]  ;;  %v2563_v10 = vor.u32 %v3649_v8, %v2562_v7  ;;  %v3681_v11 = vld [vmem:[%s5839_s3 + $0x1b4] sm:$0xf0]  ;;  %v3647_v12 = vld [vmem:[%s5839_s3 + $0xac] sm:$0xf] }
  0x28   :  { %541 = vmatpush.bf16.msrb.mxu2 %v2595_v49  ;;  %554 = vmatpush.bf16.msrb.mxu3 %v2723_v52  ;;  %v2564_v13 = vld [vmem:[%s5839_s3 + $0xb8] sm:$0xf0]  ;;  %v2691_v14 = vor.u32 %v3681_v11, %v2690_v9  ;;  %v3679_v16 = vld [vmem:[%s5839_s3 + $0x1ac] sm:$0xf]  ;;  %v2546_v19 = vld [vmem:[%s5839_s3 + $0x88] sm:$0xf] }
  0x29   :  { %v2567_v15 = vor.u32 %v3647_v12, %v2564_v13  ;;  %v2692_v17 = vld [vmem:[%s5839_s3 + $0x1b8] sm:$0xf0]  ;;  %v3645_v20 = vld [vmem:[%s5839_s3 + $0x94] sm:$0xf0]  ;;  %v2674_v21 = vld [vmem:[%s5839_s3 + $0x188] sm:$0xf] }
  0x2a   :  { %v2695_v18 = vor.u32 %v3679_v16, %v2692_v17  ;;  %v2547_v22 = vor.u32 %v3645_v20, %v2546_v19  ;;  %v3677_v23 = vld [vmem:[%s5839_s3 + $0x194] sm:$0xf0]  ;;  %v3643_v24 = vld [vmem:[%s5839_s3 + $0x8c] sm:$0xf]  ;;  %v2548_v25 = vld [vmem:[%s5839_s3 + $0x98] sm:$0xf0] }
  0x2b   :  { %522 = vmatpush.bf16.msrb.mxu0 %v2479_v59  ;;  %535 = vmatpush.bf16.msrb.mxu1 %v2607_v60  ;;  %v2675_v26 = vor.u32 %v3677_v23, %v2674_v21  ;;  %v2551_v27 = vor.u32 %v3643_v24, %v2548_v25  ;;  %v3675_v28 = vld [vmem:[%s5839_s3 + $0x18c] sm:$0xf]  ;;  %v2676_v29 = vld [vmem:[%s5839_s3 + $0x198] sm:$0xf0]  ;;  %v2530_v31 = vld [vmem:[%s5839_s3 + $0x68] sm:$0xf] }
  0x2c   :  { %542 = vmatpush.bf16.msrb.mxu2 %v2579_v0  ;;  %555 = vmatpush.bf16.msrb.mxu3 %v2707_v1  ;;  %v2679_v30 = vor.u32 %v3675_v28, %v2676_v29  ;;  %v3641_v32 = vld [vmem:[%s5839_s3 + $0x74] sm:$0xf0]  ;;  %v2658_v33 = vld [vmem:[%s5839_s3 + $0x168] sm:$0xf]  ;;  %v3639_v36 = vld [vmem:[%s5839_s3 + $0x6c] sm:$0xf] }
  0x2d   :  { %v2531_v34 = vor.u32 %v3641_v32, %v2530_v31  ;;  %v3673_v35 = vld [vmem:[%s5839_s3 + $0x174] sm:$0xf0]  ;;  %v2532_v37 = vld [vmem:[%s5839_s3 + $0x78] sm:$0xf0]  ;;  %v3671_v40 = vld [vmem:[%s5839_s3 + $0x16c] sm:$0xf] }
  0x2e   :  { %v2659_v38 = vor.u32 %v3673_v35, %v2658_v33  ;;  %v2535_v39 = vor.u32 %v3639_v36, %v2532_v37  ;;  %v2660_v41 = vld [vmem:[%s5839_s3 + $0x178] sm:$0xf0]  ;;  %v2514_v42 = vld [vmem:[%s5839_s3 + $0x48] sm:$0xf]  ;;  %v3637_v44 = vld [vmem:[%s5839_s3 + $0x54] sm:$0xf0] }
  0x2f   :  { %567 = vmatpush.bf16.msra.mxu0 %v2599_v61  ;;  %580 = vmatpush.bf16.msra.mxu1 %v2727_v62  ;;  %v2663_v43 = vor.u32 %v3671_v40, %v2660_v41  ;;  %v2642_v45 = vld [vmem:[%s5839_s3 + $0x148] sm:$0xf]  ;;  %v3669_v46 = vld [vmem:[%s5839_s3 + $0x154] sm:$0xf0]  ;;  %v2515_v47 = vor.u32 %v3637_v44, %v2514_v42  ;;  %v3635_v49 = vld [vmem:[%s5839_s3 + $0x4c] sm:$0xf] }
  0x30   :  { %543 = vmatpush.bf16.msrb.mxu2 %v2563_v10  ;;  %556 = vmatpush.bf16.msrb.mxu3 %v2691_v14  ;;  %v2643_v48 = vor.u32 %v3669_v46, %v2642_v45  ;;  %v2516_v50 = vld [vmem:[%s5839_s3 + $0x58] sm:$0xf0]  ;;  %v3667_v51 = vld [vmem:[%s5839_s3 + $0x14c] sm:$0xf]  ;;  %v2498_v54 = vld [vmem:[%s5839_s3 + $0x28] sm:$0xf] }
  0x31   :  { %v2519_v52 = vor.u32 %v3635_v49, %v2516_v50  ;;  %v2644_v53 = vld [vmem:[%s5839_s3 + $0x158] sm:$0xf0]  ;;  %v3633_v55 = vld [vmem:[%s5839_s3 + $0x34] sm:$0xf0]  ;;  %v2626_v57 = vld [vmem:[%s5839_s3 + $0x128] sm:$0xf] }
  0x32   :  { %v2647_v56 = vor.u32 %v3667_v51, %v2644_v53  ;;  %v3665_v58 = vld [vmem:[%s5839_s3 + $0x134] sm:$0xf0]  ;;  %v3631_v59 = vld [vmem:[%s5839_s3 + $0x2c] sm:$0xf]  ;;  %v2499_v60 = vor.u32 %v3633_v55, %v2498_v54  ;;  %v2500_v61 = vld [vmem:[%s5839_s3 + $0x38] sm:$0xf0] }
  0x33   :  { %568 = vmatpush.bf16.msra.mxu0 %v2583_v5  ;;  %581 = vmatpush.bf16.msra.mxu1 %v2711_v6  ;;  %v3663_v62 = vld [vmem:[%s5839_s3 + $0x12c] sm:$0xf]  ;;  %v2628_v63 = vld [vmem:[%s5839_s3 + $0x138] sm:$0xf0]  ;;  %v2627_v0 = vor.u32 %v3665_v58, %v2626_v57  ;;  %v2503_v1 = vor.u32 %v3631_v59, %v2500_v61  ;;  %v2482_v2 = vld [vmem:[%s5839_s3 + $0x8] sm:$0xf] }
  0x34   :  { %544 = vmatpush.bf16.msrb.mxu2 %v2547_v22  ;;  %557 = vmatpush.bf16.msrb.mxu3 %v2675_v26  ;;  %v3629_v3 = vld [vmem:[%s5839_s3 + $0x14] sm:$0xf0]  ;;  %v2610_v4 = vld [vmem:[%s5839_s3 + $0x108] sm:$0xf]  ;;  %v2631_v5 = vor.u32 %v3663_v62, %v2628_v63  ;;  %v3627_v7 = vld [vmem:[%s5839_s3 + $0xc] sm:$0xf] }
  0x35   :  { %v3661_v6 = vld [vmem:[%s5839_s3 + $0x114] sm:$0xf0]  ;;  %v2484_v8 = vld [vmem:[%s5839_s3 + $0x18] sm:$0xf0]  ;;  %v3659_v9 = vld [vmem:[%s5839_s3 + $0x10c] sm:$0xf]  ;;  %v2483_v11 = vor.u32 %v3629_v3, %v2482_v2 }
  0x36   :  { %v2612_v10 = vld [vmem:[%s5839_s3 + $0x118] sm:$0xf0]  ;;  %v2611_v12 = vor.u32 %v3661_v6, %v2610_v4  ;;  %v2487_v13 = vor.u32 %v3627_v7, %v2484_v8  ;;  %v3150_v22 = vld [vmem:[%s5841_s5 + $0x348] sm:$0xf]  ;;  %v3798_v23 = vld [vmem:[%s5841_s5 + $0x360] sm:$0xf0] }
  0x37   :  { %569 = vmatpush.bf16.msra.mxu0 %v2567_v15  ;;  %582 = vmatpush.bf16.msra.mxu1 %v2695_v18  ;;  %v2615_v14 = vor.u32 %v3659_v9, %v2612_v10  ;;  %v33_v15 = vld [vmem:[%s5838_s2] sm:$0x3]  ;;  %v2926_v24 = vld [vmem:[%s5841_s5 + $0x188] sm:$0xf]  ;;  %v3742_v25 = vld [vmem:[%s5841_s5 + $0x1a0] sm:$0xf0] }
  0x38   :  { %545 = vmatpush.bf16.msrb.mxu2 %v2531_v34  ;;  %558 = vmatpush.bf16.msrb.mxu3 %v2659_v38  ;;  %v35_v16 = vperm.slane %v33_v15, 0  ;;  %v36_v17 = vperm.slane %v33_v15, 1  ;;  %v3598_v26 = vld [vmem:[%s5841_s5 + $0x6c8] sm:$0xf]  ;;  %v3854_v31 = vld [vmem:[%s5841_s5 + $0x520] sm:$0xf0]  ;;  %v3151_v34 = vor.u32 %v3798_v23, %v3150_v22  ;;  %v2927_v37 = vor.u32 %v3742_v25, %v2926_v24 }
  0x39   :  { %v3122_v35 = vld [vmem:[%s5841_s5 + $0x310] sm:$0xf]  ;;  %v3791_v36 = vld [vmem:[%s5841_s5 + $0x328] sm:$0xf0]  ;;  %v3094_v49 = vld [vmem:[%s5841_s5 + $0x2d8] sm:$0xf] }
  0x3a   :  { %v2898_v38 = vld [vmem:[%s5841_s5 + $0x150] sm:$0xf]  ;;  %v3847_v45 = vld [vmem:[%s5841_s5 + $0x4e8] sm:$0xf0]  ;;  %v3784_v50 = vld [vmem:[%s5841_s5 + $0x2f0] sm:$0xf0] }
  0x3b   :  { %570 = vmatpush.bf16.msra.mxu0 %v2551_v27  ;;  %583 = vmatpush.bf16.msra.mxu1 %v2679_v30  ;;  %v3910_v27 = vld [vmem:[%s5841_s5 + $0x6e0] sm:$0xf0]  ;;  %v3374_v30 = vld [vmem:[%s5841_s5 + $0x508] sm:$0xf]  ;;  %v3570_v41 = vld [vmem:[%s5841_s5 + $0x690] sm:$0xf] }
  0x3c   :  { %546 = vmatpush.bf16.msrb.mxu2 %v2515_v47  ;;  %559 = vmatpush.bf16.msrb.mxu3 %v2643_v48  ;;  %v3599_v40 = vor.u32 %v3910_v27, %v3598_v26  ;;  %v3375_v42 = vor.u32 %v3854_v31, %v3374_v30  ;;  %v3346_v44 = vld [vmem:[%s5841_s5 + $0x4d0] sm:$0xf]  ;;  %v3123_v48 = vor.u32 %v3791_v36, %v3122_v35  ;;  %v3728_v53 = vld [vmem:[%s5841_s5 + $0x130] sm:$0xf0]  ;;  %v3542_v55 = vld [vmem:[%s5841_s5 + $0x658] sm:$0xf] }
  0x3d   :  { %v3896_v57 = vld [vmem:[%s5841_s5 + $0x670] sm:$0xf0]  ;;  %v3318_v58 = vld [vmem:[%s5841_s5 + $0x498] sm:$0xf]  ;;  %v3066_v61 = vld [vmem:[%s5841_s5 + $0x2a0] sm:$0xf] }
  0x3e   :  { %v3840_v59 = vld [vmem:[%s5841_s5 + $0x4b0] sm:$0xf0]  ;;  %v3777_v62 = vld [vmem:[%s5841_s5 + $0x2b8] sm:$0xf0]  ;;  %v3543_v2 = vor.u32 %v3896_v57, %v3542_v55  ;;  %v3514_v3 = vld [vmem:[%s5841_s5 + $0x620] sm:$0xf] }
  0x3f   :  { %571 = vmatpush.bf16.msra.mxu0 %v2535_v39  ;;  %584 = vmatpush.bf16.msra.mxu1 %v2663_v43  ;;  %v3735_v39 = vld [vmem:[%s5841_s5 + $0x168] sm:$0xf0]  ;;  %v3319_v4 = vor.u32 %v3840_v59, %v3318_v58  ;;  %v3290_v6 = vld [vmem:[%s5841_s5 + $0x460] sm:$0xf]  ;;  %v3833_v7 = vld [vmem:[%s5841_s5 + $0x478] sm:$0xf0]  ;;  %v3067_v8 = vor.u32 %v3777_v62, %v3066_v61 }
  0x40   :  { %547 = vmatpush.bf16.msrb.mxu2 %v2499_v60  ;;  %560 = vmatpush.bf16.msrb.mxu3 %v2627_v0  ;;  %v3903_v43 = vld [vmem:[%s5841_s5 + $0x6a8] sm:$0xf0]  ;;  %v2899_v51 = vor.u32 %v3735_v39, %v2898_v38  ;;  %v3095_v60 = vor.u32 %v3784_v50, %v3094_v49  ;;  %v2842_v0 = vld [vmem:[%s5841_s5 + $0xe0] sm:$0xf]  ;;  %v3038_v9 = vld [vmem:[%s5841_s5 + $0x268] sm:$0xf] }
  0x41   :  { %v3571_v54 = vor.u32 %v3903_v43, %v3570_v41  ;;  %v3770_v10 = vld [vmem:[%s5841_s5 + $0x280] sm:$0xf0]  ;;  %v3486_v15 = vld [vmem:[%s5841_s5 + $0x5e8] sm:$0xf]  ;;  %v3763_v22 = vld [vmem:[%s5841_s5 + $0x248] sm:$0xf0] }
  0x42   :  { %v2786_v24 = vld [vmem:[%s5841_s5 + $0x70] sm:$0xf]  ;;  %v3707_v25 = vld [vmem:[%s5841_s5 + $0x88] sm:$0xf0]  ;;  %v2982_v35 = vld [vmem:[%s5841_s5 + $0x1f8] sm:$0xf] }
  0x43   :  { %572 = vmatpush.bf16.msra.mxu0 %v2519_v52  ;;  %585 = vmatpush.bf16.msra.mxu1 %v2647_v56  ;;  %v2870_v52 = vld [vmem:[%s5841_s5 + $0x118] sm:$0xf]  ;;  %v3347_v56 = vor.u32 %v3847_v45, %v3346_v44  ;;  %v3458_v27 = vld [vmem:[%s5841_s5 + $0x5b0] sm:$0xf]  ;;  %v3819_v31 = vld [vmem:[%s5841_s5 + $0x408] sm:$0xf0] }
  0x44   :  { %548 = vmatpush.bf16.msrb.mxu2 %v2483_v11  ;;  %561 = vmatpush.bf16.msrb.mxu3 %v2611_v12  ;;  %v2871_v63 = vor.u32 %v3728_v53, %v2870_v52  ;;  %v2814_v12 = vld [vmem:[%s5841_s5 + $0xa8] sm:$0xf]  ;;  %v3234_v30 = vld [vmem:[%s5841_s5 + $0x3f0] sm:$0xf]  ;;  %v3756_v36 = vld [vmem:[%s5841_s5 + $0x210] sm:$0xf0] }
  0x45   :  { %v2758_v38 = vld [vmem:[%s5841_s5 + $0x38] sm:$0xf]  ;;  %v3868_v41 = vld [vmem:[%s5841_s5 + $0x590] sm:$0xf0]  ;;  %v2983_v44 = vor.u32 %v3756_v36, %v2982_v35  ;;  %v2954_v45 = vld [vmem:[%s5841_s5 + $0x1c0] sm:$0xf] }
  0x46   :  { %v3430_v39 = vld [vmem:[%s5841_s5 + $0x578] sm:$0xf]  ;;  %v3812_v43 = vld [vmem:[%s5841_s5 + $0x3d0] sm:$0xf0]  ;;  %v2730_v49 = vld [vmem:[%s5841_s5] sm:$0xf] }
  0x47   :  { %573 = vmatpush.bf16.msra.mxu0 %v2503_v1  ;;  %586 = vmatpush.bf16.msra.mxu1 %v2631_v5  ;;  %v3721_v1 = vld [vmem:[%s5841_s5 + $0xf8] sm:$0xf0]  ;;  %v3152_v53 = vld [vmem:[%s5841_s5 + $0x364] sm:$0xf0]  ;;  %v3851_v36 = vld [vmem:[%s5841_s5 + $0x50c] sm:$0xf] }
  0x48   :  { %v3889_v5 = vld [vmem:[%s5841_s5 + $0x638] sm:$0xf0]  ;;  %v2843_v11 = vor.u32 %v3721_v1, %v2842_v0  ;;  %v2928_v55 = vld [vmem:[%s5841_s5 + $0x1a4] sm:$0xf0]  ;;  %v3124_v1 = vld [vmem:[%s5841_s5 + $0x32c] sm:$0xf0] }
  0x49   :  { %v3693_v50 = vld [vmem:[%s5841_s5 + $0x18] sm:$0xf0]  ;;  %v3600_v61 = vld [vmem:[%s5841_s5 + $0x6e4] sm:$0xf0]  ;;  %s2453_s8 = sshll.u32 %s5843_s7, 4  ;;  %vm2444_vm2 = vcmask 130048   ;;  %s2454_s8 = int_to_ptr.hbm [resolvable:$true] %s2453_s8 }
  0x4a   :  { %v3861_v57 = vld [vmem:[%s5841_s5 + $0x558] sm:$0xf0]  ;;  %v2731_v59 = vor.u32 %v3693_v50, %v2730_v49  ;;  %v2816_v35 = vld [vmem:[%s5841_s5 + $0xc4] sm:$0xf0]  ;;  %v3746_v50 = vld [vmem:[%s5841_s5 + $0x1c4] sm:$0xf] }
  0x4b   :  { %574 = vmatpush.bf16.msra.mxu0 %v2487_v13  ;;  %587 = vmatpush.bf16.msra.mxu1 %v2615_v14  ;;  %v3714_v13 = vld [vmem:[%s5841_s5 + $0xc0] sm:$0xf0]  ;;  %v3515_v14 = vor.u32 %v3889_v5, %v3514_v3  ;;  %v2900_v3 = vld [vmem:[%s5841_s5 + $0x16c] sm:$0xf0] }
  0x4c   :  { %v2815_v23 = vor.u32 %v3714_v13, %v2814_v12  ;;  %v3774_v13 = vld [vmem:[%s5841_s5 + $0x2a4] sm:$0xf] }
  0x8b   :  { %v74_v18 = vpop.f32.mrf.mxu0  ;;  %v87_v19 = vpop.f32.mrf.mxu1 }
  0x8c   :  { %v75_v20 = vadd.f32 %v74_v18, %v35_v16  ;;  %v88_v21 = vadd.f32 %v87_v19, %v36_v17  ;;  %v3291_v16 = vor.u32 %v3833_v7, %v3290_v6  ;;  %v3882_v17 = vld [vmem:[%s5841_s5 + $0x600] sm:$0xf0]  ;;  %v3262_v18 = vld [vmem:[%s5841_s5 + $0x428] sm:$0xf]  ;;  %v3781_v7 = vld [vmem:[%s5841_s5 + $0x2dc] sm:$0xf] }
  0x8d   :  { %v3826_v19 = vld [vmem:[%s5841_s5 + $0x440] sm:$0xf0]  ;;  %v3487_v26 = vor.u32 %v3882_v17, %v3486_v15  ;;  %v3068_v15 = vld [vmem:[%s5841_s5 + $0x2bc] sm:$0xf0] }
  0x8e   :  { %v91_v28 = vmax.f32 %v75_v20, 0.0  ;;  %v92_v29 = vmax.f32 %v88_v21, 0.0  ;;  %v3039_v20 = vor.u32 %v3770_v10, %v3038_v9  ;;  %v3010_v21 = vld [vmem:[%s5841_s5 + $0x230] sm:$0xf]  ;;  %v3096_v9 = vld [vmem:[%s5841_s5 + $0x2f4] sm:$0xf0] }
  0x8f   :  { %v3725_v10 = vld [vmem:[%s5841_s5 + $0x11c] sm:$0xf]  ;;  %v3099_v12 = vor.u32 %v3781_v7, %v3096_v9  ;;  %v2844_v17 = vld [vmem:[%s5841_s5 + $0xfc] sm:$0xf0]  ;;  %v3872_v7 = vld [vmem:[%s5841_s5 + $0x5b4] sm:$0xf] }
  0x90   :  { %v4441_v32 = vpack.c.bf16 %v91_v28, %v91_v28  ;;  %v4443_v33 = vpack.c.bf16 %v92_v29, %v92_v29  ;;  %v3263_v28 = vor.u32 %v3826_v19, %v3262_v18  ;;  %v3875_v29 = vld [vmem:[%s5841_s5 + $0x5c8] sm:$0xf0]  ;;  %v3071_v18 = vor.u32 %v3774_v13, %v3068_v15  ;;  %v3865_v13 = vld [vmem:[%s5841_s5 + $0x57c] sm:$0xf] }
  0x92   :  { %497 = vmatmul.bf16.vlgmr.msra.gmra.mxu2 %v4441_v32  ;;  %510 = vmatmul.bf16.vlgmr.msra.gmra.mxu3 %v4443_v33 }
  0x93   :  { %523 = vmatmul.bf16.vlgmr.msrb.gmra.mxu0 %v4441_v32  ;;  %536 = vmatmul.bf16.vlgmr.msrb.gmra.mxu1 %v4443_v33  ;;  %v76_v46 = vpop.f32.mrf.mxu0  ;;  %v89_v47 = vpop.f32.mrf.mxu1 }
  0x94   :  { %2038 = vmatpush.bf16.msra.mxu3 %v3151_v34  ;;  %2025 = vmatpush.bf16.msra.mxu2 %v2927_v37  ;;  %v3011_v34 = vor.u32 %v3763_v22, %v3010_v21  ;;  %v2787_v37 = vor.u32 %v3707_v25, %v2786_v24  ;;  %v3749_v46 = vld [vmem:[%s5841_s5 + $0x1d8] sm:$0xf0]  ;;  %v3040_v21 = vld [vmem:[%s5841_s5 + $0x284] sm:$0xf0]  ;;  %v3012_v24 = vld [vmem:[%s5841_s5 + $0x24c] sm:$0xf0] }
  0x95   :  { %2064 = vmatpush.bf16.msrb.mxu1 %v3599_v40  ;;  %2051 = vmatpush.bf16.msrb.mxu0 %v3375_v42  ;;  %v3235_v40 = vor.u32 %v3819_v31, %v3234_v30  ;;  %v3206_v42 = vld [vmem:[%s5841_s5 + $0x3b8] sm:$0xf]  ;;  %v2955_v58 = vor.u32 %v3749_v46, %v2954_v45  ;;  %v3900_v25 = vld [vmem:[%s5841_s5 + $0x694] sm:$0xf]  ;;  %v2788_v45 = vld [vmem:[%s5841_s5 + $0x8c] sm:$0xf0] }
  0x96   :  { %v3207_v52 = vor.u32 %v3812_v43, %v3206_v42  ;;  %v3544_v42 = vld [vmem:[%s5841_s5 + $0x674] sm:$0xf0]  ;;  %v3844_v46 = vld [vmem:[%s5841_s5 + $0x4d4] sm:$0xf] }
  0x98   :  { %2039 = vmatpush.bf16.msra.mxu3 %v3123_v48  ;;  %2026 = vmatpush.bf16.msra.mxu2 %v2899_v51  ;;  %v3795_v48 = vld [vmem:[%s5841_s5 + $0x34c] sm:$0xf]  ;;  %v3431_v51 = vor.u32 %v3868_v41, %v3430_v39  ;;  %v2984_v39 = vld [vmem:[%s5841_s5 + $0x214] sm:$0xf0] }
  0x99   :  { %2065 = vmatpush.bf16.msrb.mxu1 %v3571_v54  ;;  %2052 = vmatpush.bf16.msrb.mxu0 %v3347_v56  ;;  %v3739_v54 = vld [vmem:[%s5841_s5 + $0x18c] sm:$0xf]  ;;  %v3402_v56 = vld [vmem:[%s5841_s5 + $0x540] sm:$0xf]  ;;  %v3155_v62 = vor.u32 %v3795_v48, %v3152_v53  ;;  %v3348_v48 = vld [vmem:[%s5841_s5 + $0x4ec] sm:$0xf0] }
  0x9a   :  { %v2931_v0 = vor.u32 %v3739_v54, %v2928_v55  ;;  %v3351_v49 = vor.u32 %v3844_v46, %v3348_v48  ;;  %v3886_v53 = vld [vmem:[%s5841_s5 + $0x624] sm:$0xf]  ;;  %v3516_v54 = vld [vmem:[%s5841_s5 + $0x63c] sm:$0xf0]  ;;  %v2934_v48 = vld [vmem:[%s5841_s5 + $0x190] sm:$0xf] }
  0x9b   :  { %v3519_v55 = vor.u32 %v3886_v53, %v3516_v54  ;;  %v3102_v53 = vld [vmem:[%s5841_s5 + $0x2e0] sm:$0xf]  ;;  %v3785_v54 = vld [vmem:[%s5841_s5 + $0x2f8] sm:$0xf0] }
  0x9c   :  { %2040 = vmatpush.bf16.msra.mxu3 %v3095_v60  ;;  %2027 = vmatpush.bf16.msra.mxu2 %v2871_v63  ;;  %v3907_v60 = vld [vmem:[%s5841_s5 + $0x6cc] sm:$0xf]  ;;  %v3788_v63 = vld [vmem:[%s5841_s5 + $0x314] sm:$0xf] }
  0x9d   :  { %2066 = vmatpush.bf16.msrb.mxu1 %v3543_v2  ;;  %2053 = vmatpush.bf16.msrb.mxu0 %v3319_v4  ;;  %v3732_v2 = vld [vmem:[%s5841_s5 + $0x154] sm:$0xf]  ;;  %v3403_v4 = vor.u32 %v3861_v57, %v3402_v56  ;;  %v3603_v5 = vor.u32 %v3907_v60, %v3600_v61  ;;  %v3127_v6 = vor.u32 %v3788_v63, %v3124_v1  ;;  %v3697_v56 = vld [vmem:[%s5841_s5 + $0x3c] sm:$0xf]  ;;  %v2760_v57 = vld [vmem:[%s5841_s5 + $0x54] sm:$0xf0] }
  0x9e   :  { %v3320_v60 = vld [vmem:[%s5841_s5 + $0x4b4] sm:$0xf0]  ;;  %v3488_v63 = vld [vmem:[%s5841_s5 + $0x604] sm:$0xf0]  ;;  %v3690_v1 = vld [vmem:[%s5841_s5 + $0x4] sm:$0xf] }
  0xa0   :  { %2041 = vmatpush.bf16.msra.mxu3 %v3067_v8  ;;  %2028 = vmatpush.bf16.msra.mxu2 %v2843_v11  ;;  %v2903_v8 = vor.u32 %v3732_v2, %v2900_v3  ;;  %v2872_v11 = vld [vmem:[%s5841_s5 + $0x134] sm:$0xf0]  ;;  %v2732_v2 = vld [vmem:[%s5841_s5 + $0x1c] sm:$0xf0]  ;;  %v3830_v3 = vld [vmem:[%s5841_s5 + $0x464] sm:$0xf] }
  0xa1   :  { %2067 = vmatpush.bf16.msrb.mxu1 %v3515_v14  ;;  %2054 = vmatpush.bf16.msrb.mxu0 %v3291_v16  ;;  %v2875_v14 = vor.u32 %v3725_v10, %v2872_v11  ;;  %v3718_v16 = vld [vmem:[%s5841_s5 + $0xe4] sm:$0xf]  ;;  %v3823_v10 = vld [vmem:[%s5841_s5 + $0x42c] sm:$0xf]  ;;  %v3264_v11 = vld [vmem:[%s5841_s5 + $0x444] sm:$0xf0] }
  0xa2   :  { %549 = vmatmul.bf16.vlgmr.msrb.gmra.mxu2 %v4441_v32  ;;  %562 = vmatmul.bf16.vlgmr.msrb.gmra.mxu3 %v4443_v33  ;;  %v2847_v19 = vor.u32 %v3718_v16, %v2844_v17  ;;  %v3816_v16 = vld [vmem:[%s5841_s5 + $0x3f4] sm:$0xf]  ;;  %v3236_v17 = vld [vmem:[%s5841_s5 + $0x40c] sm:$0xf0] }
  0xa3   :  { %575 = vmatmul.bf16.vlgmr.msra.gmra.mxu0 %v4441_v32  ;;  %588 = vmatmul.bf16.vlgmr.msra.gmra.mxu1 %v4443_v33  ;;  %v3700_v32 = vld [vmem:[%s5841_s5 + $0x50] sm:$0xf0]  ;;  %v3459_v33 = vor.u32 %v3875_v29, %v3458_v27  ;;  %v3572_v27 = vld [vmem:[%s5841_s5 + $0x6ac] sm:$0xf0]  ;;  %v3805_v29 = vld [vmem:[%s5841_s5 + $0x398] sm:$0xf0] }
  0xa4   :  { %2042 = vmatpush.bf16.msra.mxu3 %v3039_v20  ;;  %2029 = vmatpush.bf16.msra.mxu2 %v2815_v23  ;;  %v2759_v47 = vor.u32 %v3700_v32, %v2758_v38  ;;  %v3767_v20 = vld [vmem:[%s5841_s5 + $0x26c] sm:$0xf]  ;;  %v3760_v23 = vld [vmem:[%s5841_s5 + $0x234] sm:$0xf]  ;;  %v3575_v30 = vor.u32 %v3900_v25, %v3572_v27  ;;  %v3376_v38 = vld [vmem:[%s5841_s5 + $0x524] sm:$0xf0] }
  0xa5   :  { %2068 = vmatpush.bf16.msrb.mxu1 %v3487_v26  ;;  %2055 = vmatpush.bf16.msrb.mxu0 %v3263_v28  ;;  %v3043_v22 = vor.u32 %v3767_v20, %v3040_v21  ;;  %v3015_v26 = vor.u32 %v3760_v23, %v3012_v24  ;;  %v3178_v28 = vld [vmem:[%s5841_s5 + $0x380] sm:$0xf]  ;;  %v3379_v32 = vor.u32 %v3851_v36, %v3376_v38  ;;  %v3208_v23 = vld [vmem:[%s5841_s5 + $0x3d4] sm:$0xf0]  ;;  %v3799_v38 = vld [vmem:[%s5841_s5 + $0x368] sm:$0xf0] }
  0xa6   :  { %v3179_v31 = vor.u32 %v3805_v29, %v3178_v28  ;;  %v3404_v20 = vld [vmem:[%s5841_s5 + $0x55c] sm:$0xf0] }
  0xa7   :  { %v4810_v25 = vld [vmem:[%s5840_s4] sm:$0xf] }
  0xa8   :  { %2043 = vmatpush.bf16.msra.mxu3 %v3011_v34  ;;  %2030 = vmatpush.bf16.msra.mxu2 %v2787_v37  ;;  %v3711_v34 = vld [vmem:[%s5841_s5 + $0xac] sm:$0xf]  ;;  %v3180_v27 = vld [vmem:[%s5841_s5 + $0x39c] sm:$0xf0]  ;;  %v162_v28 = vperm.slane %v4810_v25, 1 }
  0xa9   :  { %2069 = vmatpush.bf16.msrb.mxu1 %v3459_v33  ;;  %2056 = vmatpush.bf16.msrb.mxu0 %v3235_v40  ;;  %v2819_v37 = vor.u32 %v3711_v34, %v2816_v35  ;;  %v3753_v33 = vld [vmem:[%s5841_s5 + $0x1fc] sm:$0xf]  ;;  %v161_v35 = vperm.slane %v4810_v25, 0 }
  0xaa   :  { %v3893_v40 = vld [vmem:[%s5841_s5 + $0x65c] sm:$0xf]  ;;  %v2987_v41 = vor.u32 %v3753_v33, %v2984_v39 }
  0xab   :  { %v3547_v43 = vor.u32 %v3893_v40, %v3544_v42 }
  0xac   :  { %2044 = vmatpush.bf16.msra.mxu3 %v2983_v44  ;;  %2031 = vmatpush.bf16.msra.mxu2 %v2759_v47  ;;  %v3704_v44 = vld [vmem:[%s5841_s5 + $0x74] sm:$0xf] }
  0xad   :  { %2070 = vmatpush.bf16.msrb.mxu1 %v3431_v51  ;;  %2057 = vmatpush.bf16.msrb.mxu0 %v3207_v52  ;;  %v2791_v47 = vor.u32 %v3704_v44, %v2788_v45  ;;  %v2956_v51 = vld [vmem:[%s5841_s5 + $0x1dc] sm:$0xf0]  ;;  %v3792_v44 = vld [vmem:[%s5841_s5 + $0x330] sm:$0xf0] }
  0xae   :  { %v2959_v52 = vor.u32 %v3746_v50, %v2956_v51 }
  0xb0   :  { %2045 = vmatpush.bf16.msra.mxu3 %v2955_v58  ;;  %2032 = vmatpush.bf16.msra.mxu2 %v2731_v59  ;;  %v3837_v58 = vld [vmem:[%s5841_s5 + $0x49c] sm:$0xf]  ;;  %v2763_v59 = vor.u32 %v3697_v56, %v2760_v57  ;;  %v2906_v56 = vld [vmem:[%s5841_s5 + $0x158] sm:$0xf]  ;;  %v3736_v57 = vld [vmem:[%s5841_s5 + $0x170] sm:$0xf0] }
  0xb1   :  { %2071 = vmatpush.bf16.msrb.mxu1 %v3403_v4  ;;  %2058 = vmatpush.bf16.msrb.mxu0 %v3179_v31  ;;  %v3323_v61 = vor.u32 %v3837_v58, %v3320_v60  ;;  %v2735_v4 = vor.u32 %v3690_v1, %v2732_v2  ;;  %v164_v60 = vperm.slane %v4810_v25, 3 }
  0xb4   :  { %2090 = vmatpush.bf16.msrb.mxu3 %v3155_v62  ;;  %2077 = vmatpush.bf16.msrb.mxu2 %v2931_v0  ;;  %v3879_v62 = vld [vmem:[%s5841_s5 + $0x5ec] sm:$0xf] }
  0xb5   :  { %2116 = vmatpush.bf16.msra.mxu1 %v3603_v5  ;;  %2103 = vmatpush.bf16.msra.mxu0 %v3379_v32  ;;  %v3491_v0 = vor.u32 %v3879_v62, %v3488_v63  ;;  %v3292_v5 = vld [vmem:[%s5841_s5 + $0x47c] sm:$0xf0]  ;;  %v2907_v62 = vor.u32 %v3736_v57, %v2906_v56  ;;  %v3074_v63 = vld [vmem:[%s5841_s5 + $0x2a8] sm:$0xf]  ;;  %v3750_v56 = vld [vmem:[%s5841_s5 + $0x1e0] sm:$0xf0] }
  0xb6   :  { %v3522_v57 = vld [vmem:[%s5841_s5 + $0x628] sm:$0xf] }
  0xb8   :  { %2091 = vmatpush.bf16.msrb.mxu3 %v3127_v6  ;;  %2078 = vmatpush.bf16.msrb.mxu2 %v2903_v8  ;;  %v3295_v6 = vor.u32 %v3830_v3, %v3292_v5  ;;  %v3460_v8 = vld [vmem:[%s5841_s5 + $0x5cc] sm:$0xf0]  ;;  %v2878_v3 = vld [vmem:[%s5841_s5 + $0x120] sm:$0xf] }
  0xb9   :  { %2117 = vmatpush.bf16.msra.mxu1 %v3575_v30  ;;  %2104 = vmatpush.bf16.msra.mxu0 %v3351_v49  ;;  %v3463_v9 = vor.u32 %v3872_v7, %v3460_v8  ;;  %v3743_v49 = vld [vmem:[%s5841_s5 + $0x1a8] sm:$0xf0]  ;;  %v163_v7 = vperm.slane %v4810_v25, 2  ;;  %v3046_v8 = vld [vmem:[%s5841_s5 + $0x270] sm:$0xf] }
  0xba   :  { %v3764_v25 = vld [vmem:[%s5841_s5 + $0x250] sm:$0xf0] }
  0xbc   :  { %2092 = vmatpush.bf16.msrb.mxu3 %v3099_v12  ;;  %2079 = vmatpush.bf16.msrb.mxu2 %v2875_v14  ;;  %v3267_v12 = vor.u32 %v3823_v10, %v3264_v11  ;;  %v3432_v14 = vld [vmem:[%s5841_s5 + $0x594] sm:$0xf0]  ;;  %v3771_v11 = vld [vmem:[%s5841_s5 + $0x288] sm:$0xf0] }
  0xbd   :  { %2118 = vmatpush.bf16.msra.mxu1 %v3547_v43  ;;  %2105 = vmatpush.bf16.msra.mxu0 %v3323_v61  ;;  %v3435_v15 = vor.u32 %v3865_v13, %v3432_v14  ;;  %v3130_v43 = vld [vmem:[%s5841_s5 + $0x318] sm:$0xf]  ;;  %v3103_v61 = vor.u32 %v3785_v54, %v3102_v53  ;;  %v3911_v13 = vld [vmem:[%s5841_s5 + $0x6e8] sm:$0xf0]  ;;  %v2850_v14 = vld [vmem:[%s5841_s5 + $0xe8] sm:$0xf] }
  0xbe   :  { %v3131_v51 = vor.u32 %v3792_v44, %v3130_v43  ;;  %v2962_v54 = vld [vmem:[%s5841_s5 + $0x1c8] sm:$0xf] }
  0xc0   :  { %2093 = vmatpush.bf16.msrb.mxu3 %v3071_v18  ;;  %2080 = vmatpush.bf16.msrb.mxu2 %v2847_v19  ;;  %v3239_v18 = vor.u32 %v3816_v16, %v3236_v17  ;;  %v3858_v19 = vld [vmem:[%s5841_s5 + $0x544] sm:$0xf] }
  0xc1   :  { %2119 = vmatpush.bf16.msra.mxu1 %v3519_v55  ;;  %2106 = vmatpush.bf16.msra.mxu0 %v3295_v6  ;;  %v3407_v21 = vor.u32 %v3858_v19, %v3404_v20  ;;  %v3047_v20 = vor.u32 %v3771_v11, %v3046_v8  ;;  %v3132_v11 = vld [vmem:[%s5841_s5 + $0x334] sm:$0xf0] }
  0xc4   :  { %2094 = vmatpush.bf16.msrb.mxu3 %v3043_v22  ;;  %2081 = vmatpush.bf16.msrb.mxu2 %v2819_v37  ;;  %v3809_v22 = vld [vmem:[%s5841_s5 + $0x3bc] sm:$0xf]  ;;  %v3158_v37 = vld [vmem:[%s5841_s5 + $0x350] sm:$0xf] }
  0xc5   :  { %2120 = vmatpush.bf16.msra.mxu1 %v3491_v0  ;;  %2107 = vmatpush.bf16.msra.mxu0 %v3267_v12  ;;  %v3211_v24 = vor.u32 %v3809_v22, %v3208_v23  ;;  %v3778_v0 = vld [vmem:[%s5841_s5 + $0x2c0] sm:$0xf0]  ;;  %v3606_v12 = vld [vmem:[%s5841_s5 + $0x6d0] sm:$0xf]  ;;  %v3018_v22 = vld [vmem:[%s5841_s5 + $0x238] sm:$0xf] }
  0xc6   :  { %v3075_v6 = vor.u32 %v3778_v0, %v3074_v63  ;;  %v2766_v63 = vld [vmem:[%s5841_s5 + $0x40] sm:$0xf]  ;;  %v3701_v0 = vld [vmem:[%s5841_s5 + $0x58] sm:$0xf0] }
  0xc7   :  { %v2767_v8 = vor.u32 %v3701_v0, %v2766_v63  ;;  %v3761_v0 = vld [vmem:[%s5841_s5 + $0x23c] sm:$0xf] }
  0xc8   :  { %2095 = vmatpush.bf16.msrb.mxu3 %v3015_v26  ;;  %2082 = vmatpush.bf16.msrb.mxu2 %v2791_v47  ;;  %v3802_v26 = vld [vmem:[%s5841_s5 + $0x384] sm:$0xf] }
  0xc9   :  { %2121 = vmatpush.bf16.msra.mxu1 %v3463_v9  ;;  %2108 = vmatpush.bf16.msra.mxu0 %v3239_v18  ;;  %v3183_v29 = vor.u32 %v3802_v26, %v3180_v27  ;;  %v3578_v26 = vld [vmem:[%s5841_s5 + $0x698] sm:$0xf]  ;;  %v3904_v27 = vld [vmem:[%s5841_s5 + $0x6b0] sm:$0xf0] }
  0xcc   :  { %2096 = vmatpush.bf16.msrb.mxu3 %v2987_v41  ;;  %2083 = vmatpush.bf16.msrb.mxu2 %v2763_v59  ;;  %v3159_v41 = vor.u32 %v3799_v38, %v3158_v37  ;;  %v3019_v38 = vor.u32 %v3764_v25, %v3018_v22  ;;  %v3782_v25 = vld [vmem:[%s5841_s5 + $0x2e4] sm:$0xf] }
  0xcd   :  { %2122 = vmatpush.bf16.msra.mxu1 %v3435_v15  ;;  %2109 = vmatpush.bf16.msra.mxu0 %v3211_v24  ;;  %v3722_v15 = vld [vmem:[%s5841_s5 + $0x100] sm:$0xf0] }
  0xce   :  { %v2851_v24 = vor.u32 %v3722_v15, %v2850_v14  ;;  %v3298_v14 = vld [vmem:[%s5841_s5 + $0x468] sm:$0xf]  ;;  %v3834_v15 = vld [vmem:[%s5841_s5 + $0x480] sm:$0xf0] }
  0xd0   :  { %2097 = vmatpush.bf16.msrb.mxu3 %v2959_v52  ;;  %2084 = vmatpush.bf16.msrb.mxu2 %v2735_v4  ;;  %v2935_v52 = vor.u32 %v3743_v49, %v2934_v48  ;;  %v3729_v4 = vld [vmem:[%s5841_s5 + $0x138] sm:$0xf0]  ;;  %v3708_v49 = vld [vmem:[%s5841_s5 + $0x90] sm:$0xf0] }
  0xd1   :  { %2123 = vmatpush.bf16.msra.mxu1 %v3407_v21  ;;  %2110 = vmatpush.bf16.msra.mxu0 %v3183_v29  ;;  %v2879_v10 = vor.u32 %v3729_v4, %v2878_v3  ;;  %v3607_v21 = vor.u32 %v3911_v13, %v3606_v12  ;;  %v2963_v3 = vor.u32 %v3750_v56, %v2962_v54  ;;  %v2738_v12 = vld [vmem:[%s5841_s5 + $0x8] sm:$0xf]  ;;  %v3694_v13 = vld [vmem:[%s5841_s5 + $0x20] sm:$0xf0]  ;;  %v3608_v54 = vld [vmem:[%s5841_s5 + $0x6ec] sm:$0xf0] }
  0xd2   :  { %v2739_v22 = vor.u32 %v3694_v13, %v2738_v12 }
 0x110   :  { %v524_v30 = vpop.f32.mrf.mxu0  ;;  %v537_v31 = vpop.f32.mrf.mxu1 }
 0x111   :  { %v525_v34 = vadd.f32 %v524_v30, %v162_v28 }
 0x113   :  { %v538_v36 = vadd.f32 %v537_v31, %v525_v34  ;;  %v2822_v31 = vld [vmem:[%s5841_s5 + $0xb0] sm:$0xf]  ;;  %v3715_v34 = vld [vmem:[%s5841_s5 + $0xc8] sm:$0xf0] }
 0x114   :  { %v2823_v44 = vor.u32 %v3715_v34, %v2822_v31  ;;  %v3733_v31 = vld [vmem:[%s5841_s5 + $0x15c] sm:$0xf]  ;;  %v2908_v34 = vld [vmem:[%s5841_s5 + $0x174] sm:$0xf0] }
 0x115   :  { %v594_v32 = vmax.f32 %v538_v36, 0.0  ;;  %v498_v33 = vpop.f32.mrf.mxu2  ;;  %v511_v39 = vpop.f32.mrf.mxu3  ;;  %v3855_v36 = vld [vmem:[%s5841_s5 + $0x528] sm:$0xf0] }
 0x116   :  { %v499_v40 = vadd.f32 %v498_v33, %v161_v35  ;;  %v3382_v35 = vld [vmem:[%s5841_s5 + $0x510] sm:$0xf]  ;;  %v2990_v33 = vld [vmem:[%s5841_s5 + $0x200] sm:$0xf] }
 0x117   :  { %v4826_v42 = vpack.c.bf16 %v594_v32, %v594_v32  ;;  %v3579_v32 = vor.u32 %v3904_v27, %v3578_v26  ;;  %v3104_v26 = vld [vmem:[%s5841_s5 + $0x2fc] sm:$0xf0] }
 0x118   :  { %v512_v45 = vadd.f32 %v511_v39, %v499_v40  ;;  %v526_v46 = vpop.f32.mrf.mxu0  ;;  %v539_v47 = vpop.f32.mrf.mxu1  ;;  %v3757_v39 = vld [vmem:[%s5841_s5 + $0x218] sm:$0xf0]  ;;  %v3550_v40 = vld [vmem:[%s5841_s5 + $0x660] sm:$0xf] }
 0x119   :  { %2046 = vmatmul.bf16.vlgmr.msra.gmra.mxu3 %v4826_v42  ;;  %v2794_v46 = vld [vmem:[%s5841_s5 + $0x78] sm:$0xf] }
 0x11a   :  { %v593_v50 = vmax.f32 %v512_v45, 0.0  ;;  %2142 = vmatpush.bf16.msra.mxu3 %v3159_v41  ;;  %v3897_v41 = vld [vmem:[%s5841_s5 + $0x678] sm:$0xf0]  ;;  %v3383_v45 = vor.u32 %v3855_v36, %v3382_v35  ;;  %v3107_v35 = vor.u32 %v3782_v25, %v3104_v26  ;;  %v3438_v36 = vld [vmem:[%s5841_s5 + $0x580] sm:$0xf] }
 0x11b   :  { %v3551_v53 = vor.u32 %v3897_v41, %v3550_v40  ;;  %v3242_v40 = vld [vmem:[%s5841_s5 + $0x3f8] sm:$0xf]  ;;  %v3820_v41 = vld [vmem:[%s5841_s5 + $0x410] sm:$0xf0] }
 0x11c   :  { %v4847_v55 = vpack.c.bf16 %v593_v50, %v593_v50  ;;  %v3354_v50 = vld [vmem:[%s5841_s5 + $0x4d8] sm:$0xf] }
 0x11d   :  { %v500_v58 = vpop.f32.mrf.mxu2  ;;  %v513_v59 = vpop.f32.mrf.mxu3  ;;  %v3356_v25 = vld [vmem:[%s5841_s5 + $0x4f4] sm:$0xf0] }
 0x11e   :  { %2143 = vmatpush.bf16.msra.mxu3 %v3131_v51  ;;  %2033 = vmatmul.bf16.vlgmr.msra.gmra.mxu2 %v4847_v55  ;;  %v3848_v51 = vld [vmem:[%s5841_s5 + $0x4f0] sm:$0xf0]  ;;  %v3890_v58 = vld [vmem:[%s5841_s5 + $0x640] sm:$0xf0]  ;;  %v2795_v59 = vor.u32 %v3708_v49, %v2794_v46  ;;  %v2880_v46 = vld [vmem:[%s5841_s5 + $0x13c] sm:$0xf0] }
 0x11f   :  { %2129 = vmatpush.bf16.msra.mxu2 %v2935_v52  ;;  %v2991_v52 = vor.u32 %v3757_v39, %v2990_v33  ;;  %v3523_v4 = vor.u32 %v3890_v58, %v3522_v57  ;;  %v3076_v33 = vld [vmem:[%s5841_s5 + $0x2c4] sm:$0xf0]  ;;  %v2911_v39 = vor.u32 %v3733_v31, %v2908_v34  ;;  %v3862_v49 = vld [vmem:[%s5841_s5 + $0x560] sm:$0xf0]  ;;  %v3214_v57 = vld [vmem:[%s5841_s5 + $0x3c0] sm:$0xf] }
 0x120   :  { %v576_v1 = vpop.f32.mrf.mxu0  ;;  %v589_v2 = vpop.f32.mrf.mxu1  ;;  %v3813_v58 = vld [vmem:[%s5841_s5 + $0x3d8] sm:$0xf0]  ;;  %v3524_v31 = vld [vmem:[%s5841_s5 + $0x644] sm:$0xf0] }
 0x121   :  { %v577_v5 = vadd.f32 %v576_v1, %v164_v60  ;;  %v3355_v60 = vor.u32 %v3848_v51, %v3354_v50  ;;  %v3326_v1 = vld [vmem:[%s5841_s5 + $0x4a0] sm:$0xf]  ;;  %v3768_v50 = vld [vmem:[%s5841_s5 + $0x274] sm:$0xf]  ;;  %v3243_v51 = vor.u32 %v3820_v41, %v3242_v40 }
 0x122   :  { %2144 = vmatpush.bf16.msra.mxu3 %v3103_v61  ;;  %v3796_v61 = vld [vmem:[%s5841_s5 + $0x354] sm:$0xf] }
 0x123   :  { %v590_v9 = vadd.f32 %v589_v2, %v577_v5  ;;  %2130 = vmatpush.bf16.msra.mxu2 %v2907_v62  ;;  %v3160_v62 = vld [vmem:[%s5841_s5 + $0x36c] sm:$0xf0]  ;;  %v3841_v2 = vld [vmem:[%s5841_s5 + $0x4b8] sm:$0xf0] }
 0x124   :  { %v3163_v5 = vor.u32 %v3796_v61, %v3160_v62  ;;  %v2852_v61 = vld [vmem:[%s5841_s5 + $0x104] sm:$0xf0] }
 0x125   :  { %v596_v16 = vmax.f32 %v590_v9, 0.0  ;;  %v550_v17 = vpop.f32.mrf.mxu2  ;;  %v563_v18 = vpop.f32.mrf.mxu3  ;;  %v3327_v9 = vor.u32 %v3841_v2, %v3326_v1  ;;  %v3215_v1 = vor.u32 %v3813_v58, %v3214_v57  ;;  %v3020_v2 = vld [vmem:[%s5841_s5 + $0x254] sm:$0xf0]  ;;  %v3744_v58 = vld [vmem:[%s5841_s5 + $0x1b0] sm:$0xf0] }
 0x126   :  { %2145 = vmatpush.bf16.msra.mxu3 %v3075_v6  ;;  %v551_v19 = vadd.f32 %v550_v17, %v163_v7  ;;  %v3494_v6 = vld [vmem:[%s5841_s5 + $0x5f0] sm:$0xf]  ;;  %v3883_v7 = vld [vmem:[%s5841_s5 + $0x608] sm:$0xf0]  ;;  %v3740_v17 = vld [vmem:[%s5841_s5 + $0x194] sm:$0xf]  ;;  %v3023_v12 = vor.u32 %v3761_v0, %v3020_v2 }
 0x127   :  { %v4891_v23 = vpack.c.bf16 %v596_v16, %v596_v16  ;;  %2131 = vmatpush.bf16.msra.mxu2 %v2879_v10  ;;  %v3789_v10 = vld [vmem:[%s5841_s5 + $0x31c] sm:$0xf]  ;;  %v3495_v16 = vor.u32 %v3883_v7, %v3494_v6  ;;  %v3186_v6 = vld [vmem:[%s5841_s5 + $0x388] sm:$0xf]  ;;  %v3806_v7 = vld [vmem:[%s5841_s5 + $0x3a0] sm:$0xf0] }
 0x128   :  { %v564_v28 = vadd.f32 %v563_v18, %v551_v19  ;;  %v578_v29 = vpop.f32.mrf.mxu0  ;;  %v591_v30 = vpop.f32.mrf.mxu1  ;;  %v2936_v18 = vld [vmem:[%s5841_s5 + $0x1ac] sm:$0xf0]  ;;  %v3135_v19 = vor.u32 %v3789_v10, %v3132_v11  ;;  %v3852_v10 = vld [vmem:[%s5841_s5 + $0x514] sm:$0xf]  ;;  %v2942_v57 = vld [vmem:[%s5841_s5 + $0x198] sm:$0xf] }
 0x129   :  { %2072 = vmatmul.bf16.vlgmr.msrb.gmra.mxu1 %v4891_v23  ;;  %2098 = vmatmul.bf16.vlgmr.msrb.gmra.mxu3 %v4826_v42  ;;  %v2939_v27 = vor.u32 %v3740_v17, %v2936_v18  ;;  %v3827_v29 = vld [vmem:[%s5841_s5 + $0x448] sm:$0xf0]  ;;  %v3384_v11 = vld [vmem:[%s5841_s5 + $0x52c] sm:$0xf0]  ;;  %v3894_v17 = vld [vmem:[%s5841_s5 + $0x664] sm:$0xf]  ;;  %v2943_v2 = vor.u32 %v3744_v58, %v2942_v57 }
 0x12a   :  { %v595_v37 = vmax.f32 %v564_v28, 0.0  ;;  %2146 = vmatpush.bf16.msra.mxu3 %v3047_v20  ;;  %2168 = vmatpush.bf16.msrb.mxu1 %v3607_v21  ;;  %v3466_v20 = vld [vmem:[%s5841_s5 + $0x5b8] sm:$0xf]  ;;  %v3876_v21 = vld [vmem:[%s5841_s5 + $0x5d0] sm:$0xf0] }
 0x12b   :  { %2132 = vmatpush.bf16.msra.mxu2 %v2851_v24  ;;  %v3299_v24 = vor.u32 %v3834_v15, %v3298_v14  ;;  %v3270_v28 = vld [vmem:[%s5841_s5 + $0x430] sm:$0xf]  ;;  %v3467_v30 = vor.u32 %v3876_v21, %v3466_v20  ;;  %v3754_v14 = vld [vmem:[%s5841_s5 + $0x204] sm:$0xf]  ;;  %v3187_v15 = vor.u32 %v3806_v7, %v3186_v6  ;;  %v3552_v18 = vld [vmem:[%s5841_s5 + $0x67c] sm:$0xf0]  ;;  %v3387_v20 = vor.u32 %v3852_v10, %v3384_v11 }
 0x12c   :  { %v4928_v43 = vpack.c.bf16 %v595_v37, %v595_v37  ;;  %v3869_v37 = vld [vmem:[%s5841_s5 + $0x598] sm:$0xf0]  ;;  %v3110_v0 = vld [vmem:[%s5841_s5 + $0x2e8] sm:$0xf]  ;;  %v2914_v6 = vld [vmem:[%s5841_s5 + $0x160] sm:$0xf] }
 0x12d   :  { %v552_v47 = vpop.f32.mrf.mxu2  ;;  %v565_v48 = vpop.f32.mrf.mxu3  ;;  %v3705_v21 = vld [vmem:[%s5841_s5 + $0x7c] sm:$0xf]  ;;  %v3440_v10 = vld [vmem:[%s5841_s5 + $0x59c] sm:$0xf0] }
 0x12e   :  { %2147 = vmatpush.bf16.msra.mxu3 %v3019_v38  ;;  %2169 = vmatpush.bf16.msrb.mxu1 %v3579_v32  ;;  %v3271_v38 = vor.u32 %v3827_v29, %v3270_v28  ;;  %v3775_v32 = vld [vmem:[%s5841_s5 + $0x2ac] sm:$0xf]  ;;  %v3410_v48 = vld [vmem:[%s5841_s5 + $0x548] sm:$0xf]  ;;  %v3737_v7 = vld [vmem:[%s5841_s5 + $0x178] sm:$0xf0] }
 0x12f   :  { %2059 = vmatmul.bf16.vlgmr.msrb.gmra.mxu0 %v4928_v43  ;;  %2085 = vmatmul.bf16.vlgmr.msrb.gmra.mxu2 %v4847_v55  ;;  %v3079_v47 = vor.u32 %v3775_v32, %v3076_v33  ;;  %v3747_v28 = vld [vmem:[%s5841_s5 + $0x1cc] sm:$0xf]  ;;  %v2964_v29 = vld [vmem:[%s5841_s5 + $0x1e4] sm:$0xf0]  ;;  %v2768_v32 = vld [vmem:[%s5841_s5 + $0x5c] sm:$0xf0] }
 0x130   :  { %2133 = vmatpush.bf16.msra.mxu2 %v2823_v44  ;;  %2155 = vmatpush.bf16.msrb.mxu0 %v3383_v45  ;;  %v3439_v44 = vor.u32 %v3869_v37, %v3438_v36  ;;  %v3726_v45 = vld [vmem:[%s5841_s5 + $0x124] sm:$0xf]  ;;  %v3166_v36 = vld [vmem:[%s5841_s5 + $0x358] sm:$0xf]  ;;  %v3800_v37 = vld [vmem:[%s5841_s5 + $0x370] sm:$0xf0]  ;;  %v2967_v40 = vor.u32 %v3747_v28, %v2964_v29 }
 0x131   :  { %v2883_v56 = vor.u32 %v3726_v45, %v2880_v46  ;;  %v3838_v33 = vld [vmem:[%s5841_s5 + $0x4a4] sm:$0xf]  ;;  %v3880_v45 = vld [vmem:[%s5841_s5 + $0x5f4] sm:$0xf]  ;;  %v3496_v46 = vld [vmem:[%s5841_s5 + $0x60c] sm:$0xf0] }
 0x132   :  { %2148 = vmatpush.bf16.msra.mxu3 %v2991_v52  ;;  %2170 = vmatpush.bf16.msrb.mxu1 %v3551_v53  ;;  %v3048_v52 = vld [vmem:[%s5841_s5 + $0x28c] sm:$0xf0]  ;;  %v3908_v53 = vld [vmem:[%s5841_s5 + $0x6d4] sm:$0xf] }
 0x133   :  { %v3051_v62 = vor.u32 %v3768_v50, %v3048_v52  ;;  %v3611_v63 = vor.u32 %v3908_v53, %v3608_v54  ;;  %v3793_v50 = vld [vmem:[%s5841_s5 + $0x338] sm:$0xf0]  ;;  %v2740_v52 = vld [vmem:[%s5841_s5 + $0x24] sm:$0xf0]  ;;  %v3831_v53 = vld [vmem:[%s5841_s5 + $0x46c] sm:$0xf] }
 0x134   :  { %2134 = vmatpush.bf16.msra.mxu2 %v2795_v59  ;;  %2156 = vmatpush.bf16.msrb.mxu0 %v3355_v60  ;;  %v3411_v59 = vor.u32 %v3862_v49, %v3410_v48  ;;  %v3719_v60 = vld [vmem:[%s5841_s5 + $0xec] sm:$0xf]  ;;  %v3138_v49 = vld [vmem:[%s5841_s5 + $0x320] sm:$0xf]  ;;  %v3300_v54 = vld [vmem:[%s5841_s5 + $0x484] sm:$0xf0] }
 0x135   :  { %v3912_v28 = vld [vmem:[%s5841_s5 + $0x6f0] sm:$0xf0] }
 0x136   :  { %2149 = vmatpush.bf16.msra.mxu3 %v2963_v3  ;;  %2171 = vmatpush.bf16.msrb.mxu1 %v3523_v4  ;;  %v3901_v3 = vld [vmem:[%s5841_s5 + $0x69c] sm:$0xf]  ;;  %v3580_v4 = vld [vmem:[%s5841_s5 + $0x6b4] sm:$0xf0] }
 0x137   :  { %v3583_v13 = vor.u32 %v3901_v3, %v3580_v4  ;;  %v3824_v3 = vld [vmem:[%s5841_s5 + $0x434] sm:$0xf]  ;;  %v3272_v4 = vld [vmem:[%s5841_s5 + $0x44c] sm:$0xf0] }
 0x138   :  { %2135 = vmatpush.bf16.msra.mxu2 %v2767_v8  ;;  %2157 = vmatpush.bf16.msrb.mxu0 %v3327_v9  ;;  %v3712_v8 = vld [vmem:[%s5841_s5 + $0xb4] sm:$0xf]  ;;  %v2824_v9 = vld [vmem:[%s5841_s5 + $0xcc] sm:$0xf0]  ;;  %v3275_v11 = vor.u32 %v3824_v3, %v3272_v4  ;;  %v3751_v4 = vld [vmem:[%s5841_s5 + $0x1e8] sm:$0xf0] }
 0x139   :  { %2124 = vmatmul.bf16.vlgmr.msra.gmra.mxu1 %v4891_v23  ;;  %2150 = vmatmul.bf16.vlgmr.msra.gmra.mxu3 %v4826_v42 }
 0x13a   :  { %2194 = vmatpush.bf16.msrb.mxu3 %v3163_v5  ;;  %2172 = vmatpush.bf16.msrb.mxu1 %v3495_v16  ;;  %v2855_v5 = vor.u32 %v3719_v60, %v2852_v61  ;;  %v2992_v16 = vld [vmem:[%s5841_s5 + $0x21c] sm:$0xf0]  ;;  %v3873_v60 = vld [vmem:[%s5841_s5 + $0x5bc] sm:$0xf]  ;;  %v3468_v61 = vld [vmem:[%s5841_s5 + $0x5d4] sm:$0xf0] }
 0x13b   :  { %v2995_v26 = vor.u32 %v3754_v14, %v2992_v16  ;;  %v2915_v14 = vor.u32 %v3737_v7, %v2914_v6  ;;  %v3244_v16 = vld [vmem:[%s5841_s5 + $0x414] sm:$0xf0]  ;;  %v3891_v6 = vld [vmem:[%s5841_s5 + $0x648] sm:$0xf0] }
 0x13c   :  { %2136 = vmatpush.bf16.msra.mxu2 %v2739_v22  ;;  %2158 = vmatpush.bf16.msrb.mxu0 %v3299_v24  ;;  %v2796_v22 = vld [vmem:[%s5841_s5 + $0x94] sm:$0xf0]  ;;  %v3845_v24 = vld [vmem:[%s5841_s5 + $0x4dc] sm:$0xf] }
 0x13d   :  { %v2799_v34 = vor.u32 %v3705_v21, %v2796_v22  ;;  %v3859_v21 = vld [vmem:[%s5841_s5 + $0x54c] sm:$0xf]  ;;  %v3412_v22 = vld [vmem:[%s5841_s5 + $0x564] sm:$0xf0] }
 0x13e   :  { %2195 = vmatpush.bf16.msrb.mxu3 %v3135_v19  ;;  %2173 = vmatpush.bf16.msrb.mxu1 %v3467_v30  ;;  %v2827_v19 = vor.u32 %v3712_v8, %v2824_v9  ;;  %v3887_v30 = vld [vmem:[%s5841_s5 + $0x62c] sm:$0xf]  ;;  %v3866_v9 = vld [vmem:[%s5841_s5 + $0x584] sm:$0xf] }
 0x13f   :  { %2111 = vmatmul.bf16.vlgmr.msra.gmra.mxu0 %v4928_v43  ;;  %2137 = vmatmul.bf16.vlgmr.msra.gmra.mxu2 %v4847_v55  ;;  %v3527_v41 = vor.u32 %v3887_v30, %v3524_v31  ;;  %v3810_v30 = vld [vmem:[%s5841_s5 + $0x3c4] sm:$0xf]  ;;  %v3216_v31 = vld [vmem:[%s5841_s5 + $0x3dc] sm:$0xf0] }
 0x140   :  { %2181 = vmatpush.bf16.msrb.mxu2 %v2939_v27  ;;  %2159 = vmatpush.bf16.msrb.mxu0 %v3271_v38  ;;  %v3555_v27 = vor.u32 %v3894_v17, %v3552_v18  ;;  %v3698_v38 = vld [vmem:[%s5841_s5 + $0x44] sm:$0xf]  ;;  %v3443_v17 = vor.u32 %v3866_v9, %v3440_v10  ;;  %v2886_v18 = vld [vmem:[%s5841_s5 + $0x128] sm:$0xf]  ;;  %v3797_v9 = vld [vmem:[%s5841_s5 + $0x35c] sm:$0xf] }
 0x141   :  { %v3168_v10 = vld [vmem:[%s5841_s5 + $0x374] sm:$0xf0] }
 0x142   :  { %2196 = vmatpush.bf16.msrb.mxu3 %v3107_v35  ;;  %2174 = vmatpush.bf16.msrb.mxu1 %v3439_v44  ;;  %v3359_v35 = vor.u32 %v3845_v24, %v3356_v25  ;;  %v3167_v44 = vor.u32 %v3800_v37, %v3166_v36  ;;  %v3054_v24 = vld [vmem:[%s5841_s5 + $0x278] sm:$0xf]  ;;  %v3723_v36 = vld [vmem:[%s5841_s5 + $0x108] sm:$0xf0] }
 0x144   :  { %2182 = vmatpush.bf16.msrb.mxu2 %v2911_v39  ;;  %2160 = vmatpush.bf16.msrb.mxu0 %v3243_v51  ;;  %v3328_v39 = vld [vmem:[%s5841_s5 + $0x4bc] sm:$0xf0]  ;;  %v3691_v51 = vld [vmem:[%s5841_s5 + $0xc] sm:$0xf] }
 0x145   :  { %v3331_v48 = vor.u32 %v3838_v33, %v3328_v39  ;;  %v3219_v33 = vor.u32 %v3810_v30, %v3216_v31  ;;  %v3765_v39 = vld [vmem:[%s5841_s5 + $0x258] sm:$0xf0]  ;;  %v2944_v30 = vld [vmem:[%s5841_s5 + $0x1b4] sm:$0xf0] }
 0x146   :  { %2197 = vmatpush.bf16.msrb.mxu3 %v3079_v47  ;;  %2175 = vmatpush.bf16.msrb.mxu1 %v3411_v59  ;;  %v2771_v47 = vor.u32 %v3698_v38, %v2768_v32  ;;  %v3139_v59 = vor.u32 %v3793_v50, %v3138_v49  ;;  %v3026_v32 = vld [vmem:[%s5841_s5 + $0x240] sm:$0xf]  ;;  %v3390_v49 = vld [vmem:[%s5841_s5 + $0x518] sm:$0xf]  ;;  %v3856_v50 = vld [vmem:[%s5841_s5 + $0x530] sm:$0xf0] }
 0x147   :  { %v3391_v58 = vor.u32 %v3856_v50, %v3390_v49  ;;  %v3446_v49 = vld [vmem:[%s5841_s5 + $0x588] sm:$0xf]  ;;  %v3870_v50 = vld [vmem:[%s5841_s5 + $0x5a0] sm:$0xf0] }
 0x148   :  { %2183 = vmatpush.bf16.msrb.mxu2 %v2883_v56  ;;  %2161 = vmatpush.bf16.msrb.mxu0 %v3215_v1  ;;  %v3499_v56 = vor.u32 %v3880_v45, %v3496_v46  ;;  %v3786_v1 = vld [vmem:[%s5841_s5 + $0x300] sm:$0xf0]  ;;  %v3803_v45 = vld [vmem:[%s5841_s5 + $0x38c] sm:$0xf]  ;;  %v3188_v46 = vld [vmem:[%s5841_s5 + $0x3a4] sm:$0xf0] }
 0x149   :  { %2176 = vmatmul.bf16.vlgmr.msrb.gmra.mxu1 %v4891_v23  ;;  %v3111_v8 = vor.u32 %v3786_v1, %v3110_v0  ;;  %v3849_v0 = vld [vmem:[%s5841_s5 + $0x4f8] sm:$0xf0] }
 0x14a   :  { %2198 = vmatpush.bf16.msrb.mxu3 %v3051_v62  ;;  %2220 = vmatpush.bf16.msra.mxu1 %v3611_v63  ;;  %v2743_v62 = vor.u32 %v3691_v51, %v2740_v52  ;;  %v3303_v63 = vor.u32 %v3831_v53, %v3300_v54  ;;  %v3027_v51 = vor.u32 %v3765_v39, %v3026_v32  ;;  %v2998_v54 = vld [vmem:[%s5841_s5 + $0x208] sm:$0xf]  ;;  %v3783_v32 = vld [vmem:[%s5841_s5 + $0x2ec] sm:$0xf] }
 0x14b   :  { %v3191_v53 = vor.u32 %v3803_v45, %v3188_v46  ;;  %v3112_v39 = vld [vmem:[%s5841_s5 + $0x304] sm:$0xf0]  ;;  %v2916_v45 = vld [vmem:[%s5841_s5 + $0x17c] sm:$0xf0] }
 0x14c   :  { %2184 = vmatpush.bf16.msrb.mxu2 %v2855_v5  ;;  %2162 = vmatpush.bf16.msrb.mxu0 %v3187_v15  ;;  %v3471_v5 = vor.u32 %v3873_v60, %v3468_v61  ;;  %v3817_v15 = vld [vmem:[%s5841_s5 + $0x3fc] sm:$0xf]  ;;  %v3898_v60 = vld [vmem:[%s5841_s5 + $0x680] sm:$0xf0]  ;;  %v2802_v61 = vld [vmem:[%s5841_s5 + $0x80] sm:$0xf] }
 0x14d   :  { %v3247_v25 = vor.u32 %v3817_v15, %v3244_v16 }
 0x14e   :  { %2199 = vmatpush.bf16.msrb.mxu3 %v3023_v12  ;;  %2221 = vmatpush.bf16.msra.mxu1 %v3583_v13  ;;  %v3082_v12 = vld [vmem:[%s5841_s5 + $0x2b0] sm:$0xf]  ;;  %v3779_v13 = vld [vmem:[%s5841_s5 + $0x2c8] sm:$0xf0] }
 0x14f   :  { %2163 = vmatmul.bf16.vlgmr.msrb.gmra.mxu0 %v4928_v43 }
 0x150   :  { %2185 = vmatpush.bf16.msrb.mxu2 %v2827_v19  ;;  %2207 = vmatpush.bf16.msra.mxu0 %v3387_v20  ;;  %v3730_v19 = vld [vmem:[%s5841_s5 + $0x140] sm:$0xf0]  ;;  %v3083_v20 = vor.u32 %v3779_v13, %v3082_v12  ;;  %v3334_v13 = vld [vmem:[%s5841_s5 + $0x4a8] sm:$0xf] }
 0x151   :  { %v2887_v29 = vor.u32 %v3730_v19, %v2886_v18  ;;  %v3702_v12 = vld [vmem:[%s5841_s5 + $0x60] sm:$0xf0]  ;;  %v3502_v18 = vld [vmem:[%s5841_s5 + $0x5f8] sm:$0xf]  ;;  %v3884_v19 = vld [vmem:[%s5841_s5 + $0x610] sm:$0xf0] }
 0x152   :  { %2200 = vmatpush.bf16.msrb.mxu3 %v2995_v26  ;;  %2222 = vmatpush.bf16.msra.mxu1 %v3555_v27  ;;  %v3772_v26 = vld [vmem:[%s5841_s5 + $0x290] sm:$0xf0]  ;;  %v3614_v27 = vld [vmem:[%s5841_s5 + $0x6d8] sm:$0xf]  ;;  %v3503_v31 = vor.u32 %v3884_v19, %v3502_v18  ;;  %v3194_v18 = vld [vmem:[%s5841_s5 + $0x390] sm:$0xf] }
 0x153   :  { %v3055_v37 = vor.u32 %v3772_v26, %v3054_v24  ;;  %v3615_v38 = vor.u32 %v3912_v28, %v3614_v27  ;;  %v3140_v24 = vld [vmem:[%s5841_s5 + $0x33c] sm:$0xf0]  ;;  %v3695_v26 = vld [vmem:[%s5841_s5 + $0x28] sm:$0xf0]  ;;  %v3306_v27 = vld [vmem:[%s5841_s5 + $0x470] sm:$0xf] }
 0x154   :  { %2186 = vmatpush.bf16.msrb.mxu2 %v2799_v34  ;;  %2208 = vmatpush.bf16.msra.mxu0 %v3359_v35  ;;  %v3415_v34 = vor.u32 %v3859_v21, %v3412_v22  ;;  %v2858_v35 = vld [vmem:[%s5841_s5 + $0xf0] sm:$0xf]  ;;  %v3790_v22 = vld [vmem:[%s5841_s5 + $0x324] sm:$0xf]  ;;  %v3835_v28 = vld [vmem:[%s5841_s5 + $0x488] sm:$0xf0] }
 0x155   :  { %v3807_v19 = vld [vmem:[%s5841_s5 + $0x3a8] sm:$0xf0] }
 0x156   :  { %2201 = vmatpush.bf16.msrb.mxu3 %v2967_v40  ;;  %2223 = vmatpush.bf16.msra.mxu1 %v3527_v41  ;;  %v3586_v40 = vld [vmem:[%s5841_s5 + $0x6a0] sm:$0xf]  ;;  %v3905_v41 = vld [vmem:[%s5841_s5 + $0x6b8] sm:$0xf0] }
 0x157   :  { %v3587_v52 = vor.u32 %v3905_v41, %v3586_v40  ;;  %v3278_v40 = vld [vmem:[%s5841_s5 + $0x438] sm:$0xf]  ;;  %v3828_v41 = vld [vmem:[%s5841_s5 + $0x450] sm:$0xf0] }
 0x158   :  { %2187 = vmatpush.bf16.msrb.mxu2 %v2771_v47  ;;  %2209 = vmatpush.bf16.msra.mxu0 %v3331_v48  ;;  %v2830_v47 = vld [vmem:[%s5841_s5 + $0xb8] sm:$0xf]  ;;  %v3716_v48 = vld [vmem:[%s5841_s5 + $0xd0] sm:$0xf0] }
 0x159   :  { %2202 = vmatmul.bf16.vlgmr.msrb.gmra.mxu3 %v4826_v42  ;;  %v2831_v57 = vor.u32 %v3716_v48, %v2830_v47  ;;  %v3115_v47 = vor.u32 %v3783_v32, %v3112_v39  ;;  %v3279_v48 = vor.u32 %v3828_v41, %v3278_v40  ;;  %v3364_v32 = vld [vmem:[%s5841_s5 + $0x4fc] sm:$0xf0]  ;;  %v3748_v39 = vld [vmem:[%s5841_s5 + $0x1d4] sm:$0xf] }
 0x15a   :  { %2246 = vmatpush.bf16.msra.mxu3 %v3167_v44  ;;  %2224 = vmatpush.bf16.msra.mxu1 %v3499_v56  ;;  %v2859_v44 = vor.u32 %v3723_v36, %v2858_v35  ;;  %v3758_v56 = vld [vmem:[%s5841_s5 + $0x220] sm:$0xf0]  ;;  %v3307_v36 = vor.u32 %v3835_v28, %v3306_v27  ;;  %v3195_v27 = vor.u32 %v3807_v19, %v3194_v18 }
 0x15b   :  { %v2999_v1 = vor.u32 %v3758_v56, %v2998_v54  ;;  %v3250_v54 = vld [vmem:[%s5841_s5 + $0x400] sm:$0xf]  ;;  %v3821_v56 = vld [vmem:[%s5841_s5 + $0x418] sm:$0xf0]  ;;  %v3738_v18 = vld [vmem:[%s5841_s5 + $0x180] sm:$0xf0] }
 0x15c   :  { %2188 = vmatpush.bf16.msrb.mxu2 %v2743_v62  ;;  %2210 = vmatpush.bf16.msra.mxu0 %v3303_v63  ;;  %v3709_v62 = vld [vmem:[%s5841_s5 + $0x98] sm:$0xf0]  ;;  %v3362_v63 = vld [vmem:[%s5841_s5 + $0x4e0] sm:$0xf] }
 0x15d   :  { %v2803_v7 = vor.u32 %v3709_v62, %v2802_v61  ;;  %v3251_v62 = vor.u32 %v3821_v56, %v3250_v54 }
 0x15e   :  { %2247 = vmatpush.bf16.msra.mxu3 %v3139_v59  ;;  %2225 = vmatpush.bf16.msra.mxu1 %v3471_v5  ;;  %v3558_v59 = vld [vmem:[%s5841_s5 + $0x668] sm:$0xf]  ;;  %v3530_v5 = vld [vmem:[%s5841_s5 + $0x630] sm:$0xf] }
 0x15f   :  { %2189 = vmatmul.bf16.vlgmr.msrb.gmra.mxu2 %v4847_v55  ;;  %v3559_v3 = vor.u32 %v3898_v60, %v3558_v59  ;;  %v3531_v16 = vor.u32 %v3891_v6, %v3530_v5  ;;  %v3447_v59 = vor.u32 %v3870_v50, %v3446_v49  ;;  %v3418_v60 = vld [vmem:[%s5841_s5 + $0x550] sm:$0xf]  ;;  %v3222_v5 = vld [vmem:[%s5841_s5 + $0x3c8] sm:$0xf]  ;;  %v3814_v6 = vld [vmem:[%s5841_s5 + $0x3e0] sm:$0xf0] }
 0x160   :  { %2233 = vmatpush.bf16.msra.mxu2 %v2943_v2  ;;  %2211 = vmatpush.bf16.msra.mxu0 %v3275_v11  ;;  %v2970_v2 = vld [vmem:[%s5841_s5 + $0x1d0] sm:$0xf]  ;;  %v2774_v11 = vld [vmem:[%s5841_s5 + $0x48] sm:$0xf]  ;;  %v3801_v49 = vld [vmem:[%s5841_s5 + $0x378] sm:$0xf0] }
 0x161   :  { %v2971_v15 = vor.u32 %v3751_v4, %v2970_v2  ;;  %v3616_v4 = vld [vmem:[%s5841_s5 + $0x6f4] sm:$0xf0]  ;;  %v3699_v50 = vld [vmem:[%s5841_s5 + $0x4c] sm:$0xf] }
 0x162   :  { %2248 = vmatpush.bf16.msra.mxu3 %v3111_v8  ;;  %2226 = vmatpush.bf16.msra.mxu1 %v3443_v17  ;;  %v3363_v8 = vor.u32 %v3849_v0, %v3362_v63  ;;  %v3171_v17 = vor.u32 %v3797_v9, %v3168_v10  ;;  %v3863_v63 = vld [vmem:[%s5841_s5 + $0x568] sm:$0xf0]  ;;  %v3769_v0 = vld [vmem:[%s5841_s5 + $0x27c] sm:$0xf] }
 0x163   :  { %v3419_v9 = vor.u32 %v3863_v63, %v3418_v60  ;;  %v3794_v63 = vld [vmem:[%s5841_s5 + $0x340] sm:$0xf0] }
 0x164   :  { %2234 = vmatpush.bf16.msra.mxu2 %v2915_v14  ;;  %2212 = vmatpush.bf16.msra.mxu0 %v3247_v25  ;;  %v3842_v14 = vld [vmem:[%s5841_s5 + $0x4c0] sm:$0xf0]  ;;  %v2746_v25 = vld [vmem:[%s5841_s5 + $0x10] sm:$0xf] }
 0x165   :  { %v3335_v21 = vor.u32 %v3842_v14, %v3334_v13  ;;  %v2747_v35 = vor.u32 %v3695_v26, %v2746_v25  ;;  %v3028_v13 = vld [vmem:[%s5841_s5 + $0x25c] sm:$0xf0]  ;;  %v3223_v14 = vor.u32 %v3814_v6, %v3222_v5  ;;  %v3745_v5 = vld [vmem:[%s5841_s5 + $0x1b8] sm:$0xf0] }
 0x166   :  { %2249 = vmatpush.bf16.msra.mxu3 %v3083_v20  ;;  %2227 = vmatpush.bf16.msra.mxu1 %v3415_v34  ;;  %v2775_v20 = vor.u32 %v3702_v12, %v2774_v11  ;;  %v3143_v34 = vor.u32 %v3790_v22, %v3140_v24  ;;  %v3762_v12 = vld [vmem:[%s5841_s5 + $0x244] sm:$0xf]  ;;  %v3853_v22 = vld [vmem:[%s5841_s5 + $0x51c] sm:$0xf]  ;;  %v3392_v24 = vld [vmem:[%s5841_s5 + $0x534] sm:$0xf0] }
 0x167   :  { %v3031_v25 = vor.u32 %v3762_v12, %v3028_v13  ;;  %v3118_v12 = vld [vmem:[%s5841_s5 + $0x2f0] sm:$0xf] }
 0x168   :  { %2235 = vmatpush.bf16.msra.mxu2 %v2887_v29  ;;  %2213 = vmatpush.bf16.msra.mxu0 %v3219_v33  ;;  %v3741_v29 = vld [vmem:[%s5841_s5 + $0x19c] sm:$0xf] }
 0x169   :  { %2228 = vmatmul.bf16.vlgmr.msra.gmra.mxu1 %v4891_v23  ;;  %v2947_v33 = vor.u32 %v3741_v29, %v2944_v30  ;;  %v3755_v29 = vld [vmem:[%s5841_s5 + $0x20c] sm:$0xf]  ;;  %v3000_v30 = vld [vmem:[%s5841_s5 + $0x224] sm:$0xf0] }
 0x16a   :  { %2250 = vmatpush.bf16.msra.mxu3 %v3055_v37  ;;  %2272 = vmatpush.bf16.msrb.mxu1 %v3615_v38  ;;  %v3474_v37 = vld [vmem:[%s5841_s5 + $0x5c0] sm:$0xf]  ;;  %v3877_v38 = vld [vmem:[%s5841_s5 + $0x5d8] sm:$0xf0] }
 0x16b   :  { %v3475_v46 = vor.u32 %v3877_v38, %v3474_v37  ;;  %v2804_v37 = vld [vmem:[%s5841_s5 + $0x9c] sm:$0xf0]  ;;  %v3846_v38 = vld [vmem:[%s5841_s5 + $0x4e4] sm:$0xf] }
 0x16c   :  { %2236 = vmatpush.bf16.msra.mxu2 %v2859_v44  ;;  %2214 = vmatpush.bf16.msra.mxu0 %v3191_v53  ;;  %v3734_v44 = vld [vmem:[%s5841_s5 + $0x164] sm:$0xf]  ;;  %v3084_v53 = vld [vmem:[%s5841_s5 + $0x2cc] sm:$0xf0] }
 0x16e   :  { %2251 = vmatpush.bf16.msra.mxu3 %v3027_v51  ;;  %2273 = vmatpush.bf16.msrb.mxu1 %v3587_v52  ;;  %v3776_v51 = vld [vmem:[%s5841_s5 + $0x2b4] sm:$0xf]  ;;  %v2919_v52 = vor.u32 %v3734_v44, %v2916_v45  ;;  %v2972_v44 = vld [vmem:[%s5841_s5 + $0x1ec] sm:$0xf0] }
 0x16f   :  { %2215 = vmatmul.bf16.vlgmr.msra.gmra.mxu0 %v4928_v43  ;;  %v3087_v61 = vor.u32 %v3776_v51, %v3084_v53  ;;  %v3888_v45 = vld [vmem:[%s5841_s5 + $0x634] sm:$0xf]  ;;  %v2776_v51 = vld [vmem:[%s5841_s5 + $0x64] sm:$0xf0]  ;;  %v2975_v54 = vor.u32 %v3748_v39, %v2972_v44  ;;  %v3811_v44 = vld [vmem:[%s5841_s5 + $0x3cc] sm:$0xf] }
 0x170   :  { %2237 = vmatpush.bf16.msra.mxu2 %v2831_v57  ;;  %2259 = vmatpush.bf16.msrb.mxu0 %v3391_v58  ;;  %v3727_v57 = vld [vmem:[%s5841_s5 + $0x12c] sm:$0xf]  ;;  %v2888_v58 = vld [vmem:[%s5841_s5 + $0x144] sm:$0xf0]  ;;  %v2779_v60 = vor.u32 %v3699_v50, %v2776_v51 }
 0x171   :  { %v2891_v2 = vor.u32 %v3727_v57, %v2888_v58  ;;  %v3336_v53 = vld [vmem:[%s5841_s5 + $0x4c4] sm:$0xf0]  ;;  %v3881_v58 = vld [vmem:[%s5841_s5 + $0x5fc] sm:$0xf] }
 0x172   :  { %2252 = vmatpush.bf16.msra.mxu3 %v2999_v1  ;;  %2274 = vmatpush.bf16.msrb.mxu1 %v3559_v3  ;;  %v3056_v1 = vld [vmem:[%s5841_s5 + $0x294] sm:$0xf0]  ;;  %v3909_v3 = vld [vmem:[%s5841_s5 + $0x6dc] sm:$0xf] }
 0x173   :  { %v3059_v10 = vor.u32 %v3769_v0, %v3056_v1  ;;  %v3619_v11 = vor.u32 %v3909_v3, %v3616_v4  ;;  %v3692_v0 = vld [vmem:[%s5841_s5 + $0x14] sm:$0xf]  ;;  %v2748_v1 = vld [vmem:[%s5841_s5 + $0x2c] sm:$0xf0]  ;;  %v2950_v4 = vld [vmem:[%s5841_s5 + $0x1a0] sm:$0xf] }
 0x174   :  { %2238 = vmatpush.bf16.msra.mxu2 %v2803_v7  ;;  %2260 = vmatpush.bf16.msrb.mxu0 %v3363_v8  ;;  %v3720_v7 = vld [vmem:[%s5841_s5 + $0xf4] sm:$0xf]  ;;  %v2860_v8 = vld [vmem:[%s5841_s5 + $0x10c] sm:$0xf0]  ;;  %v2951_v13 = vor.u32 %v3745_v5, %v2950_v4 }
 0x175   :  { %v3308_v3 = vld [vmem:[%s5841_s5 + $0x48c] sm:$0xf0] }
 0x176   :  { %2253 = vmatpush.bf16.msra.mxu3 %v2971_v15  ;;  %2275 = vmatpush.bf16.msrb.mxu1 %v3531_v16  ;;  %v2863_v15 = vor.u32 %v3720_v7, %v2860_v8  ;;  %v3902_v16 = vld [vmem:[%s5841_s5 + $0x6a4] sm:$0xf]  ;;  %v2751_v8 = vor.u32 %v3692_v0, %v2748_v1  ;;  %v3857_v0 = vld [vmem:[%s5841_s5 + $0x538] sm:$0xf0] }
 0x178   :  { %2239 = vmatpush.bf16.msra.mxu2 %v2775_v20  ;;  %2261 = vmatpush.bf16.msrb.mxu0 %v3335_v21  ;;  %v3713_v20 = vld [vmem:[%s5841_s5 + $0xbc] sm:$0xf]  ;;  %v2832_v21 = vld [vmem:[%s5841_s5 + $0xd4] sm:$0xf0] }
 0x179   :  { %2254 = vmatmul.bf16.vlgmr.msra.gmra.mxu3 %v4826_v42  ;;  %v2835_v28 = vor.u32 %v3713_v20, %v2832_v21 }
 0x17a   :  { %2298 = vmatpush.bf16.msrb.mxu3 %v3171_v17  ;;  %2276 = vmatpush.bf16.msrb.mxu1 %v3503_v31  ;;  %v3588_v17 = vld [vmem:[%s5841_s5 + $0x6bc] sm:$0xf0]  ;;  %v3895_v31 = vld [vmem:[%s5841_s5 + $0x66c] sm:$0xf] }
 0x17b   :  { %v3591_v26 = vor.u32 %v3902_v16, %v3588_v17  ;;  %v3280_v16 = vld [vmem:[%s5841_s5 + $0x454] sm:$0xf0]  ;;  %v2922_v17 = vld [vmem:[%s5841_s5 + $0x168] sm:$0xf] }
 0x17c   :  { %2240 = vmatpush.bf16.msra.mxu2 %v2747_v35  ;;  %2262 = vmatpush.bf16.msrb.mxu0 %v3307_v36  ;;  %v3560_v35 = vld [vmem:[%s5841_s5 + $0x684] sm:$0xf0]  ;;  %v3706_v36 = vld [vmem:[%s5841_s5 + $0x84] sm:$0xf] }
 0x17d   :  { %v3563_v40 = vor.u32 %v3895_v31, %v3560_v35  ;;  %v2807_v41 = vor.u32 %v3706_v36, %v2804_v37  ;;  %v3731_v31 = vld [vmem:[%s5841_s5 + $0x148] sm:$0xf0]  ;;  %v3860_v35 = vld [vmem:[%s5841_s5 + $0x554] sm:$0xf] }
 0x17e   :  { %2299 = vmatpush.bf16.msrb.mxu3 %v3143_v34  ;;  %2277 = vmatpush.bf16.msrb.mxu1 %v3475_v46  ;;  %v3395_v34 = vor.u32 %v3853_v22, %v3392_v24  ;;  %v3532_v46 = vld [vmem:[%s5841_s5 + $0x64c] sm:$0xf0]  ;;  %v3867_v22 = vld [vmem:[%s5841_s5 + $0x58c] sm:$0xf]  ;;  %v3448_v24 = vld [vmem:[%s5841_s5 + $0x5a4] sm:$0xf0] }
 0x17f   :  { %2241 = vmatmul.bf16.vlgmr.msra.gmra.mxu2 %v4847_v55  ;;  %v3535_v56 = vor.u32 %v3888_v45, %v3532_v46  ;;  %v3224_v45 = vld [vmem:[%s5841_s5 + $0x3e4] sm:$0xf0]  ;;  %v2866_v46 = vld [vmem:[%s5841_s5 + $0xf8] sm:$0xf] }
 0x180   :  { %2285 = vmatpush.bf16.msrb.mxu2 %v2947_v33  ;;  %2263 = vmatpush.bf16.msrb.mxu0 %v3279_v48  ;;  %v3003_v33 = vor.u32 %v3755_v29, %v3000_v30  ;;  %v3174_v48 = vld [vmem:[%s5841_s5 + $0x360] sm:$0xf]  ;;  %v2894_v30 = vld [vmem:[%s5841_s5 + $0x130] sm:$0xf] }
 0x181   :  { %v3175_v57 = vor.u32 %v3801_v49, %v3174_v48  ;;  %v3252_v29 = vld [vmem:[%s5841_s5 + $0x41c] sm:$0xf0]  ;;  %v2895_v39 = vor.u32 %v3731_v31, %v2894_v30  ;;  %v3342_v31 = vld [vmem:[%s5841_s5 + $0x4b0] sm:$0xf] }
 0x182   :  { %2300 = vmatpush.bf16.msrb.mxu3 %v3115_v47  ;;  %2278 = vmatpush.bf16.msrb.mxu1 %v3447_v59  ;;  %v3367_v47 = vor.u32 %v3846_v38, %v3364_v32  ;;  %v3504_v59 = vld [vmem:[%s5841_s5 + $0x614] sm:$0xf0]  ;;  %v3420_v38 = vld [vmem:[%s5841_s5 + $0x56c] sm:$0xf0]  ;;  %v3062_v32 = vld [vmem:[%s5841_s5 + $0x280] sm:$0xf] }
 0x183   :  { %v3507_v6 = vor.u32 %v3881_v58, %v3504_v59  ;;  %v3423_v48 = vor.u32 %v3860_v35, %v3420_v38  ;;  %v3906_v58 = vld [vmem:[%s5841_s5 + $0x6c0] sm:$0xf0]  ;;  %v3804_v59 = vld [vmem:[%s5841_s5 + $0x394] sm:$0xf] }
 0x184   :  { %2286 = vmatpush.bf16.msrb.mxu2 %v2919_v52  ;;  %2264 = vmatpush.bf16.msrb.mxu0 %v3251_v62  ;;  %v3839_v52 = vld [vmem:[%s5841_s5 + $0x4ac] sm:$0xf]  ;;  %v3146_v62 = vld [vmem:[%s5841_s5 + $0x328] sm:$0xf] }
 0x185   :  { %v3147_v7 = vor.u32 %v3794_v63, %v3146_v62  ;;  %v3717_v62 = vld [vmem:[%s5841_s5 + $0xd8] sm:$0xf0]  ;;  %v3398_v63 = vld [vmem:[%s5841_s5 + $0x520] sm:$0xf] }
 0x186   :  { %2301 = vmatpush.bf16.msrb.mxu3 %v3087_v61  ;;  %2279 = vmatpush.bf16.msrb.mxu1 %v3419_v9  ;;  %v3339_v61 = vor.u32 %v3839_v52, %v3336_v53  ;;  %v3034_v52 = vld [vmem:[%s5841_s5 + $0x248] sm:$0xf]  ;;  %v3766_v53 = vld [vmem:[%s5841_s5 + $0x260] sm:$0xf0] }
 0x187   :  { %v3035_v1 = vor.u32 %v3766_v53, %v3034_v52 }
 0x188   :  { %2287 = vmatpush.bf16.msrb.mxu2 %v2891_v2  ;;  %2265 = vmatpush.bf16.msrb.mxu0 %v3223_v14  ;;  %v3832_v2 = vld [vmem:[%s5841_s5 + $0x474] sm:$0xf]  ;;  %v3787_v14 = vld [vmem:[%s5841_s5 + $0x308] sm:$0xf0] }
 0x189   :  { %2280 = vmatmul.bf16.vlgmr.msrb.gmra.mxu1 %v4891_v23  ;;  %v3311_v9 = vor.u32 %v3832_v2, %v3308_v3  ;;  %v3119_v20 = vor.u32 %v3787_v14, %v3118_v12  ;;  %v5709_v3 = vld [vmem:[%s5842_s6] sm:$0x7f]  ;;  %v2810_v12 = vld [vmem:[%s5841_s5 + $0x88] sm:$0xf] }
 0x18a   :  { %2302 = vmatpush.bf16.msrb.mxu3 %v3059_v10  ;;  %2324 = vmatpush.bf16.msra.mxu1 %v3619_v11  ;;  %v3874_v10 = vld [vmem:[%s5841_s5 + $0x5c4] sm:$0xf]  ;;  %v3476_v11 = vld [vmem:[%s5841_s5 + $0x5dc] sm:$0xf0]  ;;  %v859_v14 = vperm.slane %v5709_v3, 0 }
 0x18b   :  { %v3479_v19 = vor.u32 %v3874_v10, %v3476_v11  ;;  %v3399_v10 = vor.u32 %v3857_v0, %v3398_v63  ;;  %v3899_v11 = vld [vmem:[%s5841_s5 + $0x688] sm:$0xf0] }
 0x18c   :  { %2288 = vmatpush.bf16.msrb.mxu2 %v2863_v15  ;;  %2266 = vmatpush.bf16.msrb.mxu0 %v3195_v27  ;;  %v3825_v15 = vld [vmem:[%s5841_s5 + $0x43c] sm:$0xf]  ;;  %v3780_v27 = vld [vmem:[%s5841_s5 + $0x2d0] sm:$0xf0] }
 0x18d   :  { %v3283_v21 = vor.u32 %v3825_v15, %v3280_v16  ;;  %v3370_v15 = vld [vmem:[%s5841_s5 + $0x4e8] sm:$0xf]  ;;  %v3850_v16 = vld [vmem:[%s5841_s5 + $0x500] sm:$0xf0] }
 0x18e   :  { %2303 = vmatpush.bf16.msrb.mxu3 %v3031_v25  ;;  %2325 = vmatpush.bf16.msra.mxu1 %v3591_v26  ;;  %v3090_v25 = vld [vmem:[%s5841_s5 + $0x2b8] sm:$0xf]  ;;  %v2923_v26 = vor.u32 %v3738_v18, %v2922_v17 }
 0x18f   :  { %2267 = vmatmul.bf16.vlgmr.msrb.gmra.mxu0 %v4928_v43  ;;  %v3091_v36 = vor.u32 %v3780_v27, %v3090_v25  ;;  %v3892_v27 = vld [vmem:[%s5841_s5 + $0x650] sm:$0xf0] }
 0x190   :  { %2289 = vmatpush.bf16.msrb.mxu2 %v2835_v28  ;;  %2311 = vmatpush.bf16.msra.mxu0 %v3395_v34  ;;  %v3818_v28 = vld [vmem:[%s5841_s5 + $0x404] sm:$0xf]  ;;  %v3451_v34 = vor.u32 %v3867_v22, %v3448_v24  ;;  %v3752_v22 = vld [vmem:[%s5841_s5 + $0x1f0] sm:$0xf0]  ;;  %v3538_v24 = vld [vmem:[%s5841_s5 + $0x638] sm:$0xf] }
 0x191   :  { %v3255_v37 = vor.u32 %v3818_v28, %v3252_v29  ;;  %v2782_v28 = vld [vmem:[%s5841_s5 + $0x50] sm:$0xf]  ;;  %v3703_v29 = vld [vmem:[%s5841_s5 + $0x68] sm:$0xf0] }
 0x192   :  { %2304 = vmatpush.bf16.msrb.mxu3 %v3003_v33  ;;  %2326 = vmatpush.bf16.msra.mxu1 %v3563_v40  ;;  %v3773_v33 = vld [vmem:[%s5841_s5 + $0x298] sm:$0xf0]  ;;  %v3622_v40 = vld [vmem:[%s5841_s5 + $0x6e0] sm:$0xf]  ;;  %v2783_v38 = vor.u32 %v3703_v29, %v2782_v28 }
 0x193   :  { %v3063_v50 = vor.u32 %v3773_v33, %v3062_v32  ;;  %v3510_v32 = vld [vmem:[%s5841_s5 + $0x600] sm:$0xf] }
 0x194   :  { %2290 = vmatpush.bf16.msrb.mxu2 %v2807_v41  ;;  %2312 = vmatpush.bf16.msra.mxu0 %v3367_v47  ;;  %v3913_v41 = vld [vmem:[%s5841_s5 + $0x6f8] sm:$0xf0]  ;;  %v3724_v47 = vld [vmem:[%s5841_s5 + $0x110] sm:$0xf0] }
 0x195   :  { %v3623_v51 = vor.u32 %v3913_v41, %v3622_v40  ;;  %v2754_v40 = vld [vmem:[%s5841_s5 + $0x18] sm:$0xf]  ;;  %v3696_v41 = vld [vmem:[%s5841_s5 + $0x30] sm:$0xf0] }
 0x196   :  { %2305 = vmatpush.bf16.msrb.mxu3 %v2975_v54  ;;  %2327 = vmatpush.bf16.msra.mxu1 %v3535_v56  ;;  %v3227_v54 = vor.u32 %v3811_v44, %v3224_v45  ;;  %v2867_v56 = vor.u32 %v3724_v47, %v2866_v46  ;;  %v3314_v45 = vld [vmem:[%s5841_s5 + $0x478] sm:$0xf]  ;;  %v3836_v46 = vld [vmem:[%s5841_s5 + $0x490] sm:$0xf0]  ;;  %v2755_v52 = vor.u32 %v3696_v41, %v2754_v40 }
 0x198   :  { %2291 = vmatpush.bf16.msrb.mxu2 %v2779_v60  ;;  %2313 = vmatpush.bf16.msra.mxu0 %v3339_v61  ;;  %v3196_v60 = vld [vmem:[%s5841_s5 + $0x3ac] sm:$0xf0]  ;;  %v2838_v61 = vld [vmem:[%s5841_s5 + $0xc0] sm:$0xf] }
 0x199   :  { %2306 = vmatmul.bf16.vlgmr.msrb.gmra.mxu3 %v4826_v42  ;;  %v3199_v5 = vor.u32 %v3804_v59, %v3196_v60  ;;  %v3829_v59 = vld [vmem:[%s5841_s5 + $0x458] sm:$0xf0] }
 0x19a   :  { %2350 = vmatpush.bf16.msra.mxu3 %v3175_v57  ;;  %2328 = vmatpush.bf16.msra.mxu1 %v3507_v6  ;;  %v3594_v57 = vld [vmem:[%s5841_s5 + $0x6a8] sm:$0xf]  ;;  %v2839_v6 = vor.u32 %v3717_v62, %v2838_v61  ;;  %v860_v62 = vperm.slane %v5709_v3, 1 }
 0x19b   :  { %v3595_v2 = vor.u32 %v3906_v58, %v3594_v57  ;;  %v3286_v58 = vld [vmem:[%s5841_s5 + $0x440] sm:$0xf] }
 0x19c   :  { %2292 = vmatpush.bf16.msrb.mxu2 %v2751_v8  ;;  %2314 = vmatpush.bf16.msra.mxu0 %v3311_v9  ;;  %v5674_v49 = vpop.f32.mrf.mxu3  ;;  %v3759_v8 = vld [vmem:[%s5841_s5 + $0x228] sm:$0xf0]  ;;  %v3566_v9 = vld [vmem:[%s5841_s5 + $0x670] sm:$0xf]  ;;  %v3287_v0 = vor.u32 %v3829_v59, %v3286_v58 }
 0x19e   :  { %2351 = vmatpush.bf16.msra.mxu3 %v3147_v7  ;;  %2329 = vmatpush.bf16.msra.mxu1 %v3479_v19  ;;  %v3006_v7 = vld [vmem:[%s5841_s5 + $0x210] sm:$0xf]  ;;  %v3567_v19 = vor.u32 %v3899_v11, %v3566_v9  ;;  %v3426_v11 = vld [vmem:[%s5841_s5 + $0x558] sm:$0xf] }
 0x19f   :  { %2293 = vmatmul.bf16.vlgmr.msrb.gmra.mxu2 %v4847_v55  ;;  %v3007_v18 = vor.u32 %v3759_v8, %v3006_v7 }
 0x1a0   :  { %2337 = vmatpush.bf16.msra.mxu2 %v2951_v13  ;;  %2315 = vmatpush.bf16.msra.mxu0 %v3283_v21  ;;  %v3710_v13 = vld [vmem:[%s5841_s5 + $0xa0] sm:$0xf0]  ;;  %v2978_v21 = vld [vmem:[%s5841_s5 + $0x1d8] sm:$0xf] }
 0x1a1   :  { %v2034_v4 = vpop.f32.mrf.mxu2  ;;  %v2979_v35 = vor.u32 %v3752_v22, %v2978_v21  ;;  %v3808_v21 = vld [vmem:[%s5841_s5 + $0x3b0] sm:$0xf0] }
 0x1a2   :  { %2352 = vmatpush.bf16.msra.mxu3 %v3119_v20  ;;  %2330 = vmatpush.bf16.msra.mxu1 %v3451_v34  ;;  %v2811_v20 = vor.u32 %v3710_v13, %v2810_v12  ;;  %v2035_v30 = vadd.f32 %v2034_v4, %v859_v14  ;;  %v3843_v34 = vld [vmem:[%s5841_s5 + $0x4c8] sm:$0xf0]  ;;  %v3258_v4 = vld [vmem:[%s5841_s5 + $0x408] sm:$0xf]  ;;  %v3864_v12 = vld [vmem:[%s5841_s5 + $0x570] sm:$0xf0] }
 0x1a3   :  { %v3343_v33 = vor.u32 %v3843_v34, %v3342_v31  ;;  %v3815_v14 = vld [vmem:[%s5841_s5 + $0x3e8] sm:$0xf0] }
 0x1a4   :  { %2338 = vmatpush.bf16.msra.mxu2 %v2923_v26  ;;  %2316 = vmatpush.bf16.msra.mxu0 %v3255_v37  ;;  %v2049_v17 = vpop.f32.mrf.mxu3  ;;  %v3371_v26 = vor.u32 %v3850_v16, %v3370_v15  ;;  %v2048_v44 = vadd.f32 %v5674_v49, %v2035_v30  ;;  %v3482_v49 = vld [vmem:[%s5841_s5 + $0x5c8] sm:$0xf]  ;;  %v3427_v15 = vor.u32 %v3864_v12, %v3426_v11 }
 0x1a6   :  { %2353 = vmatpush.bf16.msra.mxu3 %v3091_v36  ;;  %2331 = vmatpush.bf16.msra.mxu1 %v3423_v48  ;;  %v2073_v25 = vpop.f32.mrf.mxu1  ;;  %v3539_v36 = vor.u32 %v3892_v27, %v3538_v24 }
 0x1a8   :  { %2339 = vmatpush.bf16.msra.mxu2 %v2895_v39  ;;  %2317 = vmatpush.bf16.msra.mxu0 %v3227_v54  ;;  %v3885_v39 = vld [vmem:[%s5841_s5 + $0x618] sm:$0xf0]  ;;  %v3315_v54 = vor.u32 %v3836_v46, %v3314_v45 }
 0x1a9   :  { %2332 = vmatmul.bf16.vlgmr.msra.gmra.mxu1 %v4891_v23  ;;  %v2036_v37 = vpop.f32.mrf.mxu2 }
 0x1aa   :  { %2354 = vmatpush.bf16.msra.mxu3 %v3063_v50  ;;  %2376 = vmatpush.bf16.msrb.mxu1 %v3623_v51  ;;  %v3511_v51 = vor.u32 %v3885_v39, %v3510_v32 }
 0x1ac   :  { %2340 = vmatpush.bf16.msra.mxu2 %v2867_v56  ;;  %2318 = vmatpush.bf16.msra.mxu0 %v3199_v5  ;;  %v2060_v47 = vpop.f32.mrf.mxu0  ;;  %v2099_v48 = vpop.f32.mrf.mxu3  ;;  %v3878_v56 = vld [vmem:[%s5841_s5 + $0x5e0] sm:$0xf0] }
 0x1ad   :  { %v2061_v50 = vadd.f32 %v2060_v47, %v2048_v44  ;;  %v3483_v61 = vor.u32 %v3878_v56, %v3482_v49  ;;  %v3822_v5 = vld [vmem:[%s5841_s5 + $0x420] sm:$0xf0] }
 0x1ae   :  { %2355 = vmatpush.bf16.msra.mxu3 %v3035_v1  ;;  %2377 = vmatpush.bf16.msrb.mxu1 %v3595_v2  ;;  %v2075_v53 = vpop.f32.mrf.mxu1  ;;  %v3871_v1 = vld [vmem:[%s5841_s5 + $0x5a8] sm:$0xf0] }
 0x1af   :  { %2319 = vmatmul.bf16.vlgmr.msra.gmra.mxu0 %v4928_v43  ;;  %v2074_v57 = vadd.f32 %v2073_v25, %v2061_v50 }
 0x1b0   :  { %2341 = vmatpush.bf16.msra.mxu2 %v2839_v6  ;;  %2363 = vmatpush.bf16.msrb.mxu0 %v3399_v10  ;;  %v3259_v10 = vor.u32 %v3822_v5, %v3258_v4 }
 0x1b1   :  { %v2389_v60 = vsub.f32 0.0, %v2074_v57 }
 0x1b2   :  { %2356 = vmatpush.bf16.msra.mxu3 %v3007_v18  ;;  %2378 = vmatpush.bf16.msrb.mxu1 %v3567_v19  ;;  %v2086_v63 = vpop.f32.mrf.mxu2 }
 0x1b3   :  { %v2396_v2 = vmul.f32 1.442695, %v2389_v60  ;;  %v2087_v13 = vadd.f32 %v2086_v63, %v860_v62  ;;  %v862_v60 = vperm.slane %v5709_v3, 3 }
 0x1b4   :  { %2342 = vmatpush.bf16.msra.mxu2 %v2811_v20  ;;  %2364 = vmatpush.bf16.msrb.mxu0 %v3371_v26  ;;  %v2062_v6 = vpop.f32.mrf.mxu0  ;;  %v2101_v7 = vpop.f32.mrf.mxu3  ;;  %v3202_v20 = vld [vmem:[%s5841_s5 + $0x398] sm:$0xf] }
 0x1b5   :  { %3915 = vpow2.f32 %v2396_v2  ;;  %v2100_v19 = vadd.f32 %v2099_v48, %v2087_v13  ;;  %v3203_v28 = vor.u32 %v3808_v21, %v3202_v20 }
 0x1b6   :  { %2357 = vmatpush.bf16.msra.mxu3 %v2979_v35  ;;  %2379 = vmatpush.bf16.msrb.mxu1 %v3539_v36  ;;  %v2125_v9 = vpop.f32.mrf.mxu1  ;;  %v861_v36 = vperm.slane %v5709_v3, 2 }
 0x1b8   :  { %2343 = vmatpush.bf16.msra.mxu2 %v2783_v38  ;;  %2365 = vmatpush.bf16.msrb.mxu0 %v3343_v33 }
 0x1b9   :  { %2358 = vmatmul.bf16.vlgmr.msra.gmra.mxu3 %v4826_v42  ;;  %v3454_v42 = vld [vmem:[%s5841_s5 + $0x590] sm:$0xf] }
 0x1ba   :  { %2380 = vmatpush.bf16.msrb.mxu1 %v3511_v51  ;;  %v3455_v8 = vor.u32 %v3871_v1, %v3454_v42  ;;  %v2088_v16 = vpop.f32.mrf.mxu2 }
 0x1bb   :  { %v3916_v18 = vpop.eup %3915 }
 0x1bc   :  { %2344 = vmatpush.bf16.msra.mxu2 %v2755_v52  ;;  %2366 = vmatpush.bf16.msrb.mxu0 %v3315_v54  ;;  %v2410_v22 = vadd.f32 1.0, %v3916_v18  ;;  %v2112_v24 = vpop.f32.mrf.mxu0  ;;  %v2151_v25 = vpop.f32.mrf.mxu3 }
 0x1bd   :  { %v2113_v26 = vadd.f32 %v2112_v24, %v2100_v19 }
 0x1be   :  { %2381 = vmatpush.bf16.msrb.mxu1 %v3483_v61  ;;  %3917 = vrcp.f32 %v2410_v22  ;;  %v2127_v27 = vpop.f32.mrf.mxu1 }
 0x1bf   :  { %2345 = vmatmul.bf16.vlgmr.msra.gmra.mxu2 %v4847_v55  ;;  %v3230_v55 = vld [vmem:[%s5841_s5 + $0x3d0] sm:$0xf]  ;;  %v2126_v29 = vadd.f32 %v2125_v9, %v2113_v26  ;;  %s3969_s5 = smov [#allocation2]  }
 0x1c0   :  { %2367 = vmatpush.bf16.msrb.mxu0 %v3287_v0  ;;  %v3231_v17 = vor.u32 %v3815_v14, %v3230_v55  ;;  %s2451_s28 = sshll.u32 %s3969_s5, 4  ;;  %s2452_s28 = int_to_ptr.vmem [resolvable:$true] %s2451_s28 }
 0x1c1   :  { %v2390_v30 = vsub.f32 0.0, %v2126_v29 }
 0x1c2   :  { %2382 = vmatpush.bf16.msrb.mxu1 %v3455_v8  ;;  %v2138_v34 = vpop.f32.mrf.mxu2 }
 0x1c3   :  { %v2398_v31 = vmul.f32 1.442695, %v2390_v30  ;;  %v2139_v40 = vadd.f32 %v2138_v34, %v861_v36 }
 0x1c4   :  { %2368 = vmatpush.bf16.msrb.mxu0 %v3259_v10  ;;  %v3918_v35 = vpop.eup %3917  ;;  %v2114_v37 = vpop.f32.mrf.mxu0 }
 0x1c5   :  { %v2153_v38 = vpop.f32.mrf.mxu3  ;;  %v2424_v32 = vmax.f32 %v3918_v35, 0.0  ;;  %3919 = vpow2.f32 %v2398_v31  ;;  %v2152_v45 = vadd.f32 %v2151_v25, %v2139_v40 }
 0x1c6   :  { %2383 = vmatpush.bf16.msrb.mxu1 %v3427_v15  ;;  %v2177_v33 = vpop.f32.mrf.mxu1  ;;  %v863_v15 = vperm.slane %v5709_v3, 4  ;;  %v864_v38 = vperm.slane %v5709_v3, 5 }
 0x1c7   :  { %v2431_v39 = vmin.f32 %v2424_v32, 1.0 }
 0x1c8   :  { %2369 = vmatpush.bf16.msrb.mxu0 %v3231_v17 }
 0x1c9   :  { %2384 = vmatmul.bf16.vlgmr.msrb.gmra.mxu1 %v4891_v23  ;;  %2438 = vst [vmem:[#allocation2] sm:$0xff] %v2431_v39 }
 0x1ca   :  { %v2140_v44 = vpop.f32.mrf.mxu2 }
 0x1cb   :  { %v3920_v41 = vpop.eup %3919 }
 0x1cc   :  { %2370 = vmatpush.bf16.msrb.mxu0 %v3203_v28  ;;  %v2411_v23 = vadd.f32 1.0, %v3920_v41  ;;  %v2164_v46 = vpop.f32.mrf.mxu0 }
 0x1cd   :  { %v2165_v47 = vadd.f32 %v2164_v46, %v2152_v45 }
 0x1ce   :  { %3921 = vrcp.f32 %v2411_v23  ;;  %v2179_v48 = vpop.f32.mrf.mxu1 }
 0x1cf   :  { %2371 = vmatmul.bf16.vlgmr.msrb.gmra.mxu0 %v4928_v43  ;;  %v2178_v50 = vadd.f32 %v2177_v33, %v2165_v47 }
 0x1d1   :  { %v2391_v51 = vsub.f32 0.0, %v2178_v50 }
 0x1d3   :  { %v2400_v53 = vmul.f32 1.442695, %v2391_v51 }
 0x1d4   :  { %v3922_v52 = vpop.eup %3921  ;;  %v2166_v49 = vpop.f32.mrf.mxu0 }
 0x1d5   :  { %v2425_v54 = vmax.f32 %v3922_v52, 0.0  ;;  %3923 = vpow2.f32 %v2400_v53 }
 0x1d7   :  { %v2432_v43 = vmin.f32 %v2425_v54, 1.0 }
 0x1d9   :  { %2439 = vst [vmem:[#allocation2 + $0x8] sm:$0xff] %v2432_v43 }
 0x1db   :  { %v3924_v57 = vpop.eup %3923 }
 0x1dc   :  { %v2203_v56 = vpop.f32.mrf.mxu3  ;;  %v2412_v58 = vadd.f32 1.0, %v3924_v57  ;;  %v865_v57 = vperm.slane %v5709_v3, 6 }
 0x1de   :  { %3925 = vrcp.f32 %v2412_v58 }
 0x1e2   :  { %v2190_v59 = vpop.f32.mrf.mxu2 }
 0x1e3   :  { %v2191_v63 = vadd.f32 %v2190_v59, %v862_v60 }
 0x1e4   :  { %v2205_v61 = vpop.f32.mrf.mxu3  ;;  %v3926_v0 = vpop.eup %3925 }
 0x1e5   :  { %v2426_v42 = vmax.f32 %v3926_v0, 0.0  ;;  %v2204_v4 = vadd.f32 %v2203_v56, %v2191_v63 }
 0x1e6   :  { %v2229_v62 = vpop.f32.mrf.mxu1 }
 0x1e7   :  { %v2433_v2 = vmin.f32 %v2426_v42, 1.0 }
 0x1e9   :  { %2440 = vst [vmem:[#allocation2 + $0x10] sm:$0xff] %v2433_v2 }
 0x1ea   :  { %v2192_v1 = vpop.f32.mrf.mxu2 }
 0x1ec   :  { %v2216_v5 = vpop.f32.mrf.mxu0 }
 0x1ed   :  { %v2217_v6 = vadd.f32 %v2216_v5, %v2204_v4 }
 0x1ee   :  { %v2231_v7 = vpop.f32.mrf.mxu1 }
 0x1ef   :  { %v2230_v8 = vadd.f32 %v2229_v62, %v2217_v6 }
 0x1f1   :  { %v2392_v9 = vsub.f32 0.0, %v2230_v8 }
 0x1f3   :  { %v2402_v10 = vmul.f32 1.442695, %v2392_v9 }
 0x1f4   :  { %v2218_v11 = vpop.f32.mrf.mxu0 }
 0x1f5   :  { %3927 = vpow2.f32 %v2402_v10 }
 0x1fb   :  { %v3928_v13 = vpop.eup %3927 }
 0x1fc   :  { %v2255_v12 = vpop.f32.mrf.mxu3  ;;  %v2413_v55 = vadd.f32 1.0, %v3928_v13 }
 0x1fe   :  { %3929 = vrcp.f32 %v2413_v55 }
 0x202   :  { %v2242_v14 = vpop.f32.mrf.mxu2 }
 0x203   :  { %v2243_v20 = vadd.f32 %v2242_v14, %v863_v15 }
 0x204   :  { %v2257_v16 = vpop.f32.mrf.mxu3  ;;  %v3930_v17 = vpop.eup %3929 }
 0x205   :  { %v2427_v19 = vmax.f32 %v3930_v17, 0.0  ;;  %v2256_v24 = vadd.f32 %v2255_v12, %v2243_v20 }
 0x206   :  { %v2281_v18 = vpop.f32.mrf.mxu1 }
 0x207   :  { %v2434_v21 = vmin.f32 %v2427_v19, 1.0 }
 0x209   :  { %2441 = vst [vmem:[#allocation2 + $0x18] sm:$0xff] %v2434_v21 }
 0x20a   :  { %v2244_v22 = vpop.f32.mrf.mxu2 }
 0x20c   :  { %v2268_v25 = vpop.f32.mrf.mxu0 }
 0x20d   :  { %v2269_v26 = vadd.f32 %v2268_v25, %v2256_v24 }
 0x20e   :  { %v2283_v27 = vpop.f32.mrf.mxu1 }
 0x20f   :  { %v2282_v28 = vadd.f32 %v2281_v18, %v2269_v26 }
 0x211   :  { %v2393_v29 = vsub.f32 0.0, %v2282_v28 }
 0x213   :  { %v2404_v30 = vmul.f32 1.442695, %v2393_v29 }
 0x214   :  { %v2270_v31 = vpop.f32.mrf.mxu0 }
 0x215   :  { %3931 = vpow2.f32 %v2404_v30 }
 0x21b   :  { %v3932_v35 = vpop.eup %3931 }
 0x21c   :  { %v2307_v34 = vpop.f32.mrf.mxu3  ;;  %v2414_v36 = vadd.f32 1.0, %v3932_v35 }
 0x21e   :  { %3933 = vrcp.f32 %v2414_v36 }
 0x222   :  { %v2294_v37 = vpop.f32.mrf.mxu2 }
 0x223   :  { %v2295_v41 = vadd.f32 %v2294_v37, %v864_v38 }
 0x224   :  { %v2309_v32 = vpop.f32.mrf.mxu3  ;;  %v3934_v33 = vpop.eup %3933 }
 0x225   :  { %v2428_v40 = vmax.f32 %v3934_v33, 0.0  ;;  %v2308_v45 = vadd.f32 %v2307_v34, %v2295_v41 }
 0x226   :  { %v2333_v39 = vpop.f32.mrf.mxu1 }
 0x227   :  { %v2435_v44 = vmin.f32 %v2428_v40, 1.0 }
 0x229   :  { %2442 = vst [vmem:[#allocation2 + $0x20] sm:$0xff] %v2435_v44 }
 0x22a   :  { %v2296_v23 = vpop.f32.mrf.mxu2 }
 0x22c   :  { %v2320_v46 = vpop.f32.mrf.mxu0 }
 0x22d   :  { %v2321_v47 = vadd.f32 %v2320_v46, %v2308_v45 }
 0x22e   :  { %v2335_v48 = vpop.f32.mrf.mxu1 }
 0x22f   :  { %v2334_v50 = vadd.f32 %v2333_v39, %v2321_v47 }
 0x231   :  { %v2394_v51 = vsub.f32 0.0, %v2334_v50 }
 0x233   :  { %v2406_v52 = vmul.f32 1.442695, %v2394_v51 }
 0x234   :  { %v2322_v53 = vpop.f32.mrf.mxu0 }
 0x235   :  { %3935 = vpow2.f32 %v2406_v52 }
 0x23b   :  { %v3936_v49 = vpop.eup %3935 }
 0x23c   :  { %v2359_v54 = vpop.f32.mrf.mxu3  ;;  %v2415_v43 = vadd.f32 1.0, %v3936_v49 }
 0x23e   :  { %3937 = vrcp.f32 %v2415_v43 }
 0x242   :  { %v2346_v56 = vpop.f32.mrf.mxu2 }
 0x243   :  { %v2347_v60 = vadd.f32 %v2346_v56, %v865_v57 }
 0x244   :  { %v2361_v58 = vpop.f32.mrf.mxu3  ;;  %v3938_v59 = vpop.eup %3937 }
 0x245   :  { %v2429_v62 = vmax.f32 %v3938_v59, 0.0  ;;  %v2360_v42 = vadd.f32 %v2359_v54, %v2347_v60 }
 0x246   :  { %v2385_v61 = vpop.f32.mrf.mxu1 }
 0x247   :  { %v2436_v0 = vmin.f32 %v2429_v62, 1.0 }
 0x249   :  { %2443 = vst [vmem:[#allocation2 + $0x28] sm:$0xff] %v2436_v0 }
 0x24a   :  { %v2348_v63 = vpop.f32.mrf.mxu2 }
 0x24c   :  { %v2372_v1 = vpop.f32.mrf.mxu0 }
 0x24d   :  { %v2373_v2 = vadd.f32 %v2372_v1, %v2360_v42 }
 0x24e   :  { %v2387_v5 = vpop.f32.mrf.mxu1 }
 0x24f   :  { %v2386_v4 = vadd.f32 %v2385_v61, %v2373_v2 }
 0x251   :  { %v2395_v6 = vsub.f32 0.0, %v2386_v4 }
 0x253   :  { %v2408_v7 = vmul.f32 1.442695, %v2395_v6 }
 0x254   :  { %v2374_v8 = vpop.f32.mrf.mxu0 }
 0x255   :  { %3939 = vpow2.f32 %v2408_v7 }
 0x25b   :  { %v3940_v9 = vpop.eup %3939 }
 0x25c   :  { %v2416_v10 = vadd.f32 1.0, %v3940_v9 }
 0x25e   :  { %3941 = vrcp.f32 %v2416_v10 }
 0x264   :  { %v3942_v3 = vpop.eup %3941 }
 0x265   :  { %v2430_v11 = vmax.f32 %v3942_v3, 0.0 }
 0x267   :  { %v2437_v12 = vmin.f32 %v2430_v11, 1.0 }
 0x269   :  { %2445 = vst.msk [vmem:[#allocation2 + $0x30] sm:$0xff] %vm2444_vm2, %v2437_v12 }
 0x26a   :  { %2456 = dma.vmem_to_hbm [thread:$0]  %s2452_s28, 896, %s2454_s8, [#allocation3]  }
 0x26b   :  { %3967 = dma.done.wait [#allocation3], 896  }
 0x26c   :  { %3968 = vsyncadd [#allocation3], 4294966400 }
 0x26d   :  { %2461 = vsyncpa [#allocation3], 1 }

</bundles_post_ra>
